<compile_context>
chip_gen: v7x
topology: tpu7x:2x2x1
jax: 0.10.0
libtpu: 0.0.40
codegen_flags: <defaults>
</compile_context>

<pallas_src>
import functools
import math

import jax
import jax.numpy as jnp
from jax.experimental import pallas as pl
from jax.experimental.pallas import tpu as pltpu


# -----------------------------------------------------------------------------
# helpers
# -----------------------------------------------------------------------------

def _round_up(x, m):
    return -(-x // m) * m


def _triple(v):
    return (v, v, v) if isinstance(v, int) else tuple(v)


# -----------------------------------------------------------------------------
# Pallas matmul kernels (bf16 in, f32 accumulate)
# -----------------------------------------------------------------------------

def _mm_kernel_acc(a_ref, b_ref, o_ref, acc_ref):
    """Tiled matmul with K-axis accumulation in an f32 VMEM scratch."""
    @pl.when(pl.program_id(2) == 0)
    def _():
        acc_ref[...] = jnp.zeros_like(acc_ref)

    acc_ref[...] += jnp.dot(a_ref[...], b_ref[...],
                            preferred_element_type=jnp.float32)

    @pl.when(pl.program_id(2) == pl.num_programs(2) - 1)
    def _():
        o_ref[...] = acc_ref[...].astype(o_ref.dtype)


def _mm_kernel_single_k(a_ref, b_ref, o_ref):
    """K fits in one tile: no scratch, no pl.when, write directly."""
    o_ref[...] = jnp.dot(a_ref[...], b_ref[...],
                         preferred_element_type=jnp.float32).astype(o_ref.dtype)


def pallas_matmul(a, b, out_dtype=jnp.bfloat16):
    """(M, K) @ (K, N) -> (M, N).  bf16 MXU operands, f32 accumulation.

    Called from inside the outer jit (not separately jitted) so padding /
    slicing glue fuses with the surrounding graph.
    """
    M, K = a.shape
    K2, N = b.shape
    assert K == K2
    a = a.astype(jnp.bfloat16)
    b = b.astype(jnp.bfloat16)

    # Tile selection: lane dims multiples of 128, sublane multiples of 16
    # (bf16 packing), capped at 512 so double-buffered blocks fit the 16 MiB
    # v5e scoped-VMEM default with plenty of headroom (also safe on v7x).
    tk = min(512, _round_up(K, 128))
    tn = min(512, _round_up(N, 128))
    tm = min(512, _round_up(M, 16))
    Mp, Kp, Np = _round_up(M, tm), _round_up(K, tk), _round_up(N, tn)

    a_p = a if (Mp == M and Kp == K) else jnp.pad(a, ((0, Mp - M), (0, Kp - K)))
    b_p = b if (Kp == K and Np == N) else jnp.pad(b, ((0, Kp - K), (0, Np - N)))

    nk = Kp // tk
    if nk == 1:
        out = pl.pallas_call(
            _mm_kernel_single_k,
            out_shape=jax.ShapeDtypeStruct((Mp, Np), out_dtype),
            grid_spec=pltpu.PrefetchScalarGridSpec(
                num_scalar_prefetch=0,
                grid=(Mp // tm, Np // tn),
                in_specs=[pl.BlockSpec((tm, Kp), lambda i, j: (i, 0)),
                          pl.BlockSpec((Kp, tn), lambda i, j: (0, j))],
                out_specs=pl.BlockSpec((tm, tn), lambda i, j: (i, j))),
            compiler_params=pltpu.CompilerParams(
                dimension_semantics=("parallel", "parallel")),
        )(a_p, b_p)
    else:
        out = pl.pallas_call(
            _mm_kernel_acc,
            out_shape=jax.ShapeDtypeStruct((Mp, Np), out_dtype),
            grid_spec=pltpu.PrefetchScalarGridSpec(
                num_scalar_prefetch=0,
                grid=(Mp // tm, Np // tn, nk),
                in_specs=[pl.BlockSpec((tm, tk), lambda i, j, k: (i, k)),
                          pl.BlockSpec((tk, tn), lambda i, j, k: (k, j))],
                out_specs=pl.BlockSpec((tm, tn), lambda i, j, k: (i, j)),
                scratch_shapes=[pltpu.VMEM((tm, tn), jnp.float32)]),
            compiler_params=pltpu.CompilerParams(
                dimension_semantics=("parallel", "parallel", "arbitrary")),
        )(a_p, b_p)

    if Mp != M or Np != N:
        out = out[:M, :N]
    return out


# -----------------------------------------------------------------------------
# BatchNorm (training-mode batch statistics) + ReLU, tiled over rows
# -----------------------------------------------------------------------------

def _bn_stats_kernel(x_ref, sums_ref):
    """Accumulate per-channel sum / sum-of-squares over row blocks.

    Output block (2, C) is resident across the (arbitrary) grid axis.
    """
    @pl.when(pl.program_id(0) == 0)
    def _():
        sums_ref[...] = jnp.zeros_like(sums_ref)

    x = x_ref[...].astype(jnp.float32)                      # (tm, C)
    s = jnp.sum(x, axis=0, keepdims=True)                   # (1, C)
    ss = jnp.sum(x * x, axis=0, keepdims=True)               # (1, C)
    sums_ref[...] += jnp.concatenate([s, ss], axis=0)         # (2, C)


def _scale_shift_relu_kernel(x_ref, sc_ref, sh_ref, o_ref):
    x = x_ref[...].astype(jnp.float32)
    y = x * sc_ref[...] + sh_ref[...]
    o_ref[...] = jnp.maximum(y, 0.0).astype(o_ref.dtype)


def batchnorm_relu(x2d, gamma, beta, eps=1e-5):
    """Training-mode BatchNorm over axis 0 (per-channel on last axis) + ReLU.

    Two passes, both tiled over rows (no full-array VMEM block).  Output bf16.
    """
    M, C = x2d.shape
    tm = min(512, _round_up(M, 16))
    Mp = _round_up(M, tm)
    xp = x2d if Mp == M else jnp.pad(x2d, ((0, Mp - M), (0, 0)))
    # zero-padded rows contribute 0 to both sums; divide by the true M below.

    sums = pl.pallas_call(
        _bn_stats_kernel,
        out_shape=jax.ShapeDtypeStruct((2, C), jnp.float32),
        grid_spec=pltpu.PrefetchScalarGridSpec(
            num_scalar_prefetch=0,
            grid=(Mp // tm,),
            in_specs=[pl.BlockSpec((tm, C), lambda i: (i, 0))],
            out_specs=pl.BlockSpec((2, C), lambda i: (0, 0))),
        compiler_params=pltpu.CompilerParams(
            dimension_semantics=("arbitrary",)),
    )(xp)

    mean = sums[0] / M
    var = sums[1] / M - mean * mean          # biased variance (train mode)
    scale = gamma * jax.lax.rsqrt(var + eps)
    shift = beta - mean * scale

    out = pl.pallas_call(
        _scale_shift_relu_kernel,
        out_shape=jax.ShapeDtypeStruct((Mp, C), jnp.bfloat16),
        grid_spec=pltpu.PrefetchScalarGridSpec(
            num_scalar_prefetch=0,
            grid=(Mp // tm,),
            in_specs=[pl.BlockSpec((tm, C), lambda i: (i, 0)),
                      pl.BlockSpec((1, C), lambda i: (0, 0)),
                      pl.BlockSpec((1, C), lambda i: (0, 0))],
            out_specs=pl.BlockSpec((tm, C), lambda i: (i, 0))),
        compiler_params=pltpu.CompilerParams(
            dimension_semantics=("parallel",)),
    )(xp, scale.reshape(1, C), shift.reshape(1, C))

    return out[:M] if Mp != M else out


# -----------------------------------------------------------------------------
# Factored conv pieces (im2col glue fused by the outer jit + Pallas matmul)
# -----------------------------------------------------------------------------

def spatial_conv(x, wmat, kh, kw, stride, padding):
    """2D conv over (H, W).  x: (N,T,H,W,C) bf16, wmat: (C*kh*kw, Co) bf16."""
    N, T, H, W, C = x.shape
    sh, sw = stride
    ph, pw = padding
    xp = jnp.pad(x, ((0, 0), (0, 0), (ph, ph), (pw, pw), (0, 0)))
    Ho = (H + 2 * ph - kh) // sh + 1
    Wo = (W + 2 * pw - kw) // sw + 1
    patches = []
    for i in range(kh):
        for j in range(kw):
            patches.append(xp[:, :, i:i + sh * Ho:sh, j:j + sw * Wo:sw, :])
    p = jnp.stack(patches, axis=-1)                 # (N,T,Ho,Wo,C,kh*kw)
    a = p.reshape(N * T * Ho * Wo, C * kh * kw)     # K: C outer, tap inner
    y = pallas_matmul(a, wmat, out_dtype=jnp.bfloat16)
    return y.reshape(N, T, Ho, Wo, -1)


def temporal_conv(x, wmat, kt, stride, padding, out_dtype=jnp.float32):
    """1D conv over T.  x: (N,T,H,W,C) bf16, wmat: (C*kt, Co) bf16."""
    N, T, H, W, C = x.shape
    st, pt = stride, padding
    xp = jnp.pad(x, ((0, 0), (pt, pt), (0, 0), (0, 0), (0, 0)))
    To = (T + 2 * pt - kt) // st + 1
    patches = [xp[:, i:i + st * To:st] for i in range(kt)]
    p = jnp.stack(patches, axis=-1)                 # (N,To,H,W,C,kt)
    a = p.reshape(N * To * H * W, C * kt)           # K: C outer, tap inner
    y = pallas_matmul(a, wmat, out_dtype=out_dtype)
    return y.reshape(N, To, H, W, -1)


# -----------------------------------------------------------------------------
# SpatioTemporalConv module
# -----------------------------------------------------------------------------

def init_spatio_temporal_conv(key, in_channels, out_channels, kernel_size,
                              stride=1, padding=0):
    ks, st, pad = _triple(kernel_size), _triple(stride), _triple(padding)
    kt, kh, kw = ks
    intermed = int(math.floor(
        kt * kh * kw * in_channels * out_channels /
        (kh * kw * in_channels + kt * out_channels)))

    k1, k2 = jax.random.split(key, 2)
    # nn.Conv3d default init: kaiming_uniform(a=sqrt(5)) -> U(-1/sqrt(fan_in), ..)
    fan_s = in_channels * kh * kw
    ws = jax.random.uniform(k1, (intermed, in_channels, 1, kh, kw), jnp.float32,
                            -1.0 / math.sqrt(fan_s), 1.0 / math.sqrt(fan_s))
    fan_t = intermed * kt
    wt = jax.random.uniform(k2, (out_channels, intermed, kt, 1, 1), jnp.float32,
                            -1.0 / math.sqrt(fan_t), 1.0 / math.sqrt(fan_t))

    params = dict(
        # pre-reshaped / pre-transposed (K, N) matmul operands, stored bf16 once
        ws_mat=jnp.transpose(
            ws.reshape(intermed, in_channels * kh * kw)).astype(jnp.bfloat16),
        wt_mat=jnp.transpose(
            wt.reshape(out_channels, intermed * kt)).astype(jnp.bfloat16),
        # nn.BatchNorm3d default init
        gamma=jnp.ones((intermed,), jnp.float32),
        beta=jnp.zeros((intermed,), jnp.float32),
    )
    ref_weights = dict(ws=ws, wt=wt)   # torch-layout f32 copies (reference only)
    cfg = dict(kt=kt, kh=kh, kw=kw,
               s_stride=(st[1], st[2]), s_pad=(pad[1], pad[2]),
               t_stride=st[0], t_pad=pad[0])
    return params, ref_weights, cfg


@functools.partial(jax.jit, static_argnames=(
    "kt", "kh", "kw", "s_stride", "s_pad", "t_stride", "t_pad"))
def spatio_temporal_conv_forward(params, x, *, kt, kh, kw,
                                 s_stride, s_pad, t_stride, t_pad):
    """SpatioTemporalConv.forward.  x: (N, C, T, H, W) -> (N, Co, To, Ho, Wo)."""
    # NCTHW -> channels-last NTHWC, bf16 activations between kernels
    x = jnp.transpose(x, (0, 2, 3, 4, 1)).astype(jnp.bfloat16)

    h = spatial_conv(x, params['ws_mat'], kh, kw, s_stride, s_pad)
    N, T, Ho, Wo, Cm = h.shape
    h = batchnorm_relu(h.reshape(-1, Cm), params['gamma'], params['beta'])
    h = h.reshape(N, T, Ho, Wo, Cm)
    y = temporal_conv(h, params['wt_mat'], kt, t_stride, t_pad,
                      out_dtype=jnp.float32)
    # back to torch NCTHW
    return jnp.transpose(y, (0, 4, 1, 2, 3))


# -----------------------------------------------------------------------------
# Pure-JAX reference (mirrors the pipeline's bf16 rounding points)
# -----------------------------------------------------------------------------

def reference_forward(ws, wt, gamma, beta, x, cfg, eps=1e-5):
    f32 = jnp.float32
    xb = x.astype(jnp.bfloat16).astype(f32)
    wsb = ws.astype(jnp.bfloat16).astype(f32)
    wtb = wt.astype(jnp.bfloat16).astype(f32)

    y = jax.lax.conv_general_dilated(
        xb, wsb,
        window_strides=(1,) + cfg['s_stride'],
        padding=[(0, 0),
                 (cfg['s_pad'][0], cfg['s_pad'][0]),
                 (cfg['s_pad'][1], cfg['s_pad'][1])],
        dimension_numbers=('NCDHW', 'OIDHW', 'NCDHW'))
    y = y.astype(jnp.bfloat16).astype(f32)              # spatial-conv out is bf16

    mean = jnp.mean(y, axis=(0, 2, 3, 4), keepdims=True)
    var = jnp.mean(jnp.square(y - mean), axis=(0, 2, 3, 4), keepdims=True)
    y = ((y - mean) * jax.lax.rsqrt(var + eps)
         * gamma.reshape(1, -1, 1, 1, 1) + beta.reshape(1, -1, 1, 1, 1))
    y = jnp.maximum(y, 0.0)
    y = y.astype(jnp.bfloat16).astype(f32)              # BN/ReLU out is bf16

    z = jax.lax.conv_general_dilated(
        y, wtb,
        window_strides=(cfg['t_stride'], 1, 1),
        padding=[(cfg['t_pad'], cfg['t_pad']), (0, 0), (0, 0)],
        dimension_numbers=('NCDHW', 'OIDHW', 'NCDHW'))
    return z


# -----------------------------------------------------------------------------
# Main
# -----------------------------------------------------------------------------

if __name__ == "__main__":
    key = jax.random.PRNGKey(0)
    kp, kx = jax.random.split(key)

    in_channels, out_channels = 4, 32
    kernel_size, stride, padding = 3, (1, 2, 2), 1
    N, T, H, W = 2, 8, 16, 16

    params, ref_w, cfg = init_spatio_temporal_conv(
        kp, in_channels, out_channels, kernel_size, stride, padding)
    x = jax.random.normal(kx, (N, in_channels, T, H, W), jnp.float32)

    out = spatio_temporal_conv_forward(params, x, **cfg)
    out = jax.block_until_ready(out)

    To = (T + 2 * cfg['t_pad'] - cfg['kt']) // cfg['t_stride'] + 1
    Ho = (H + 2 * cfg['s_pad'][0] - cfg['kh']) // cfg['s_stride'][0] + 1
    Wo = (W + 2 * cfg['s_pad'][1] - cfg['kw']) // cfg['s_stride'][1] + 1
    assert out.shape == (N, out_channels, To, Ho, Wo), out.shape

    ref = reference_forward(ref_w['ws'], ref_w['wt'],
                            params['gamma'], params['beta'], x, cfg)
    ref = jax.block_until_ready(ref)
    err = float(jnp.max(jnp.abs(out - ref)))
    assert err < 5e-2, f"max abs error too large: {err}"

    print("KERNEL_OK")
</pallas_src>

<mosaic_0001>
module attributes {stable_mosaic.version = 11 : i64} {
  func.func @_bn_stats_kernel(%arg0: i32, %arg1: memref<512x26xbf16, #tpu.memory_space<vmem>>, %arg2: memref<2x26xf32, #tpu.memory_space<vmem>>) attributes {dimension_semantics = [#tpu.dimension_semantics<arbitrary>], iteration_bounds = array<i64: 2>, scalar_prefetch = 0 : i64, scratch_operands = 0 : i64, tpu.core_type = #tpu.core_type<tc>, window_params = [{transform_indices = @transform_0, window_bounds = array<i64: 512, 26>}, {pipeline_mode = #tpu.pipeline_mode<synchronous>, transform_indices = @transform_1, window_bounds = array<i64: 2, 26>}]} {
    %c0_i32 = arith.constant 0 : i32
    %0 = arith.cmpi eq, %arg0, %c0_i32 : i32
    %1 = arith.extui %0 : i1 to i32
    %c0_i32_0 = arith.constant 0 : i32
    %2 = arith.cmpi ne, %1, %c0_i32_0 : i32
    scf.if %2 {
      %cst_7 = arith.constant 0.000000e+00 : f32
      %14 = vector.broadcast %cst_7 : f32 to vector<2x26xf32>
      %c0_8 = arith.constant 0 : index
      %c0_9 = arith.constant 0 : index
      %15 = vector.load %arg2[%c0_8, %c0_9] : memref<2x26xf32, #tpu.memory_space<vmem>>, vector<2x26xf32>
      tpu.vector_store %arg2[%c0_8, %c0_9], %14 {strides = array<i32>} : memref<2x26xf32, #tpu.memory_space<vmem>>, vector<2x26xf32>,
    } else {
    }
    %c0 = arith.constant 0 : index
    %c0_1 = arith.constant 0 : index
    %3 = vector.load %arg1[%c0, %c0_1] : memref<512x26xbf16, #tpu.memory_space<vmem>>, vector<512x26xbf16>
    %4 = arith.extf %3 : vector<512x26xbf16> to vector<512x26xf32>
    %cst = arith.constant dense<0.000000e+00> : vector<26xf32>
    %5 = vector.multi_reduction <add>, %4, %cst [0] : vector<512x26xf32> to vector<26xf32>
    %6 = vector.shape_cast %5 : vector<26xf32> to vector<1x26xf32>
    %7 = arith.mulf %4, %4 : vector<512x26xf32>
    %cst_2 = arith.constant dense<0.000000e+00> : vector<26xf32>
    %8 = vector.multi_reduction <add>, %7, %cst_2 [0] : vector<512x26xf32> to vector<26xf32>
    %9 = vector.shape_cast %8 : vector<26xf32> to vector<1x26xf32>
    %c0_3 = arith.constant 0 : index
    %c0_4 = arith.constant 0 : index
    %10 = vector.load %arg2[%c0_3, %c0_4] : memref<2x26xf32, #tpu.memory_space<vmem>>, vector<2x26xf32>
    %11 = tpu.concatenate %6, %9 in 0 : vector<1x26xf32>, vector<1x26xf32> -> vector<2x26xf32>
    %12 = arith.addf %10, %11 : vector<2x26xf32>
    %c0_5 = arith.constant 0 : index
    %c0_6 = arith.constant 0 : index
    %13 = vector.load %arg2[%c0_5, %c0_6] : memref<2x26xf32, #tpu.memory_space<vmem>>, vector<2x26xf32>
    tpu.vector_store %arg2[%c0_5, %c0_6], %12 {strides = array<i32>} : memref<2x26xf32, #tpu.memory_space<vmem>>, vector<2x26xf32>,
    return
  }
  func.func @transform_0(%arg0: i32) -> (i32, i32) {
    %c0_i32 = arith.constant 0 : i32
    %c0_i32_0 = arith.constant 0 : i32
    return %arg0, %c0_i32 : i32, i32
  }
  func.func @transform_1(%arg0: i32) -> (i32, i32) {
    %c0_i32 = arith.constant 0 : i32
    %c0_i32_0 = arith.constant 0 : i32
    %c0_i32_1 = arith.constant 0 : i32
    return %c0_i32, %c0_i32_0 : i32, i32
  }
}

module attributes {stable_mosaic.version = 11 : i64} {
  func.func @_mm_kernel_single_k(%arg0: i32, %arg1: i32, %arg2: memref<512x128xbf16, #tpu.memory_space<vmem>>, %arg3: memref<128x128xbf16, #tpu.memory_space<vmem>>, %arg4: memref<512x128xbf16, #tpu.memory_space<vmem>>) attributes {dimension_semantics = [#tpu.dimension_semantics<parallel>, #tpu.dimension_semantics<parallel>], iteration_bounds = array<i64: 2, 1>, scalar_prefetch = 0 : i64, scratch_operands = 0 : i64, tpu.core_type = #tpu.core_type<tc>, window_params = [{transform_indices = @transform_0, window_bounds = array<i64: 512, 128>}, {transform_indices = @transform_1, window_bounds = array<i64: 128, 128>}, {transform_indices = @transform_2, window_bounds = array<i64: 512, 128>}]} {
    %c0 = arith.constant 0 : index
    %c0_0 = arith.constant 0 : index
    %0 = vector.load %arg2[%c0, %c0_0] : memref<512x128xbf16, #tpu.memory_space<vmem>>, vector<512x128xbf16>
    %c0_1 = arith.constant 0 : index
    %c0_2 = arith.constant 0 : index
    %1 = vector.load %arg3[%c0_1, %c0_2] : memref<128x128xbf16, #tpu.memory_space<vmem>>, vector<128x128xbf16>
    %cst = arith.constant dense<0.000000e+00> : vector<512x128xf32>
    %2 = tpu.matmul %0, %1, %cst {dimension_numbers = #tpu.dot_dimension_numbers<[1], [0], [0], [1], [0, 0, 1, 1], [], []>} : vector<512x128xbf16>, vector<128x128xbf16>, vector<512x128xf32> -> vector<512x128xf32>
    %3 = arith.truncf %2 : vector<512x128xf32> to vector<512x128xbf16>
    %c0_3 = arith.constant 0 : index
    %c0_4 = arith.constant 0 : index
    %4 = vector.load %arg4[%c0_3, %c0_4] : memref<512x128xbf16, #tpu.memory_space<vmem>>, vector<512x128xbf16>
    tpu.vector_store %arg4[%c0_3, %c0_4], %3 {strides = array<i32>} : memref<512x128xbf16, #tpu.memory_space<vmem>>, vector<512x128xbf16>,
    return
  }
  func.func @transform_0(%arg0: i32, %arg1: i32) -> (i32, i32) {
    %c0_i32 = arith.constant 0 : i32
    %c0_i32_0 = arith.constant 0 : i32
    return %arg0, %c0_i32 : i32, i32
  }
  func.func @transform_1(%arg0: i32, %arg1: i32) -> (i32, i32) {
    %c0_i32 = arith.constant 0 : i32
    %c0_i32_0 = arith.constant 0 : i32
    return %c0_i32, %arg1 : i32, i32
  }
  func.func @transform_2(%arg0: i32, %arg1: i32) -> (i32, i32) {
    %c0_i32 = arith.constant 0 : i32
    return %arg0, %arg1 : i32, i32
  }
}

module attributes {stable_mosaic.version = 11 : i64} {
  func.func @_scale_shift_relu_kernel(%arg0: i32, %arg1: memref<512x26xbf16, #tpu.memory_space<vmem>>, %arg2: memref<1x26xf32, #tpu.memory_space<vmem>>, %arg3: memref<1x26xf32, #tpu.memory_space<vmem>>, %arg4: memref<512x26xbf16, #tpu.memory_space<vmem>>) attributes {dimension_semantics = [#tpu.dimension_semantics<parallel>], iteration_bounds = array<i64: 2>, scalar_prefetch = 0 : i64, scratch_operands = 0 : i64, tpu.core_type = #tpu.core_type<tc>, window_params = [{transform_indices = @transform_0, window_bounds = array<i64: 512, 26>}, {pipeline_mode = #tpu.pipeline_mode<synchronous>, transform_indices = @transform_1, window_bounds = array<i64: 1, 26>}, {pipeline_mode = #tpu.pipeline_mode<synchronous>, transform_indices = @transform_2, window_bounds = array<i64: 1, 26>}, {transform_indices = @transform_3, window_bounds = array<i64: 512, 26>}]} {
    %c0 = arith.constant 0 : index
    %c0_0 = arith.constant 0 : index
    %0 = vector.load %arg1[%c0, %c0_0] : memref<512x26xbf16, #tpu.memory_space<vmem>>, vector<512x26xbf16>
    %1 = arith.extf %0 : vector<512x26xbf16> to vector<512x26xf32>
    %c0_1 = arith.constant 0 : index
    %c0_2 = arith.constant 0 : index
    %2 = vector.load %arg2[%c0_1, %c0_2] : memref<1x26xf32, #tpu.memory_space<vmem>>, vector<1x26xf32>
    %3 = vector.broadcast %2 : vector<1x26xf32> to vector<512x26xf32>
    %4 = arith.mulf %1, %3 : vector<512x26xf32>
    %c0_3 = arith.constant 0 : index
    %c0_4 = arith.constant 0 : index
    %5 = vector.load %arg3[%c0_3, %c0_4] : memref<1x26xf32, #tpu.memory_space<vmem>>, vector<1x26xf32>
    %6 = vector.broadcast %5 : vector<1x26xf32> to vector<512x26xf32>
    %7 = arith.addf %4, %6 : vector<512x26xf32>
    %cst = arith.constant 0.000000e+00 : f32
    %8 = vector.broadcast %cst : f32 to vector<512x26xf32>
    %9 = arith.maximumf %7, %8 : vector<512x26xf32>
    %10 = arith.truncf %9 : vector<512x26xf32> to vector<512x26xbf16>
    %c0_5 = arith.constant 0 : index
    %c0_6 = arith.constant 0 : index
    %11 = vector.load %arg4[%c0_5, %c0_6] : memref<512x26xbf16, #tpu.memory_space<vmem>>, vector<512x26xbf16>
    tpu.vector_store %arg4[%c0_5, %c0_6], %10 {strides = array<i32>} : memref<512x26xbf16, #tpu.memory_space<vmem>>, vector<512x26xbf16>,
    return
  }
  func.func @transform_0(%arg0: i32) -> (i32, i32) {
    %c0_i32 = arith.constant 0 : i32
    %c0_i32_0 = arith.constant 0 : i32
    return %arg0, %c0_i32 : i32, i32
  }
  func.func @transform_1(%arg0: i32) -> (i32, i32) {
    %c0_i32 = arith.constant 0 : i32
    %c0_i32_0 = arith.constant 0 : i32
    %c0_i32_1 = arith.constant 0 : i32
    return %c0_i32, %c0_i32_0 : i32, i32
  }
  func.func @transform_2(%arg0: i32) -> (i32, i32) {
    %c0_i32 = arith.constant 0 : i32
    %c0_i32_0 = arith.constant 0 : i32
    %c0_i32_1 = arith.constant 0 : i32
    return %c0_i32, %c0_i32_0 : i32, i32
  }
  func.func @transform_3(%arg0: i32) -> (i32, i32) {
    %c0_i32 = arith.constant 0 : i32
    %c0_i32_0 = arith.constant 0 : i32
    return %arg0, %c0_i32 : i32, i32
  }
}

module attributes {stable_mosaic.version = 11 : i64} {
  func.func @_mm_kernel_single_k(%arg0: i32, %arg1: i32, %arg2: memref<512x128xbf16, #tpu.memory_space<vmem>>, %arg3: memref<128x128xbf16, #tpu.memory_space<vmem>>, %arg4: memref<512x128xf32, #tpu.memory_space<vmem>>) attributes {dimension_semantics = [#tpu.dimension_semantics<parallel>, #tpu.dimension_semantics<parallel>], iteration_bounds = array<i64: 2, 1>, scalar_prefetch = 0 : i64, scratch_operands = 0 : i64, tpu.core_type = #tpu.core_type<tc>, window_params = [{transform_indices = @transform_0, window_bounds = array<i64: 512, 128>}, {transform_indices = @transform_1, window_bounds = array<i64: 128, 128>}, {transform_indices = @transform_2, window_bounds = array<i64: 512, 128>}]} {
    %c0 = arith.constant 0 : index
    %c0_0 = arith.constant 0 : index
    %0 = vector.load %arg2[%c0, %c0_0] : memref<512x128xbf16, #tpu.memory_space<vmem>>, vector<512x128xbf16>
    %c0_1 = arith.constant 0 : index
    %c0_2 = arith.constant 0 : index
    %1 = vector.load %arg3[%c0_1, %c0_2] : memref<128x128xbf16, #tpu.memory_space<vmem>>, vector<128x128xbf16>
    %cst = arith.constant dense<0.000000e+00> : vector<512x128xf32>
    %2 = tpu.matmul %0, %1, %cst {dimension_numbers = #tpu.dot_dimension_numbers<[1], [0], [0], [1], [0, 0, 1, 1], [], []>} : vector<512x128xbf16>, vector<128x128xbf16>, vector<512x128xf32> -> vector<512x128xf32>
    %c0_3 = arith.constant 0 : index
    %c0_4 = arith.constant 0 : index
    %3 = vector.load %arg4[%c0_3, %c0_4] : memref<512x128xf32, #tpu.memory_space<vmem>>, vector<512x128xf32>
    tpu.vector_store %arg4[%c0_3, %c0_4], %2 {strides = array<i32>} : memref<512x128xf32, #tpu.memory_space<vmem>>, vector<512x128xf32>,
    return
  }
  func.func @transform_0(%arg0: i32, %arg1: i32) -> (i32, i32) {
    %c0_i32 = arith.constant 0 : i32
    %c0_i32_0 = arith.constant 0 : i32
    return %arg0, %c0_i32 : i32, i32
  }
  func.func @transform_1(%arg0: i32, %arg1: i32) -> (i32, i32) {
    %c0_i32 = arith.constant 0 : i32
    %c0_i32_0 = arith.constant 0 : i32
    return %c0_i32, %arg1 : i32, i32
  }
  func.func @transform_2(%arg0: i32, %arg1: i32) -> (i32, i32) {
    %c0_i32 = arith.constant 0 : i32
    return %arg0, %arg1 : i32, i32
  }
}

</mosaic_0001>

<bundles_post_ra>
// kernel: spatio_temporal_conv_forward.5
= control target key start
LH: loop header
LB: loop body
LE: loop exit
PB: predicated region body
PF: predicated region fallthrough
CT: control target
= control target key end

     0   :  { %s799_s6 = smov 0   ;;  %s1269_s0 = inlined_call_operand.vmem [shape: bf16[1024,26], index: 0, kind: input, shape index: {}]   ;;  %s1270_s1 = inlined_call_operand.vmem [shape: f32[2,26], index: 1, kind: output, shape index: {}]  }
   0x1 LB: > { %s603_s7 = sadd.s32 4294967295, %s786_s6   ;;  %p606_p0 = scmp.ge.s32.totalorder %s786_s6, 1  ;;  %s786_s6 = sphi %s799_s6, %s11_s6  }
   0x2   : > { %p83_p1 = scmp.lt.s32.totalorder %s786_s6, 3 }
   0x4   : > { %p84_p2 = pnand %p606_p0, %p83_p1 }
   0x5   : > { %s607_s8 = sshll.u32 (!%p84_p2), %s603_s7, 6  ;;  %p609_p4 = scmp.ne.s32.totalorder (!%p84_p2), %s603_s7, 0 }
   0x6   : > { %87 = sbr.rel (%p84_p2) target bundleno = 190 (0xbe), region = 24  ;;  %p99_p3 = scmp.lt.s32.totalorder (!%p84_p2), %s607_s8, 127 }
   0xd   : > { %s1272_s8 = smov (!%p99_p3, %s607_s8), 127  ;;  %107 = sbr.rel (%p609_p4) target bundleno = 20 (0x14), region = 28 }
   0xe   : > { %s608_s9 = sshll.u32 %s1272_s8, 2  ;;  %vm108_vm0 = vcmask (!%p609_p4), 205824   ;;  %v788_v0 = vmov (!%p609_p4), 0.0  }
   0xf   : > { %s810_s12 = scalar_lea.vmem %s1269_s0, %s608_s9  ;;  %109 = vst.msk [vmem:[%s1270_s1] sm:$0x3] (!%p609_p4), %vm108_vm0, %v788_v0 }
  0x14 PF: > { %v613_v1 = vld [vmem:[%s810_s12] sm:$0xff]   ;;  %v740_v2 = vld [vmem:[%s810_s12 + $0x8] sm:$0xff]   ;;  %vm238_vm1 = vcmask 211968   ;;  %v741_v6 = vld [vmem:[%s810_s12 + $0x10] sm:$0xff]   ;;  %vm570_vm2 = vcmask 1040384   ;;  %vm573_vm3 = vcmask 205824  }
  0x15   : > { %v817_v3 = vunpack.c.l.bf16 %v613_v1  ;;  %v819_v4 = vunpack.c.h.bf16 %v613_v1  ;;  %v821_v5 = vunpack.c.l.bf16 %v740_v2  ;;  %v824_v7 = vunpack.c.h.bf16 %v740_v2  ;;  %v742_v14 = vld [vmem:[%s810_s12 + $0x18] sm:$0xff]   ;;  %v743_v21 = vld [vmem:[%s810_s12 + $0x20] sm:$0xff]   ;;  %v744_v28 = vld [vmem:[%s810_s12 + $0x28] sm:$0xff]  }
  0x16   : > { %v832_v12 = vunpack.c.l.bf16 %v741_v6  ;;  %v837_v16 = vunpack.c.h.bf16 %v741_v6  ;;  %v841_v19 = vunpack.c.l.bf16 %v742_v14  ;;  %v846_v23 = vunpack.c.h.bf16 %v742_v14  ;;  %v745_v35 = vld [vmem:[%s810_s12 + $0x30] sm:$0xff]   ;;  %v746_v42 = vld [vmem:[%s810_s12 + $0x38] sm:$0xff]   ;;  %v747_v49 = vld [vmem:[%s810_s12 + $0x40] sm:$0xff]  }
  0x17   : > { %v239_v8 = vsel %vm238_vm1, %v817_v3, 0.0  ;;  %v240_v9 = vsel %vm238_vm1, %v819_v4, 0.0  ;;  %v242_v10 = vsel %vm238_vm1, %v821_v5, 0.0  ;;  %v244_v13 = vsel %vm238_vm1, %v824_v7, 0.0  ;;  %v748_v56 = vld [vmem:[%s810_s12 + $0x48] sm:$0xff]   ;;  %v749_v63 = vld [vmem:[%s810_s12 + $0x50] sm:$0xff]  }
  0x18   : > { %v241_v11 = vadd.f32 %v240_v9, %v239_v8  ;;  %v246_v17 = vsel %vm238_vm1, %v832_v12, 0.0  ;;  %v248_v20 = vsel %vm238_vm1, %v837_v16, 0.0  ;;  %v250_v24 = vsel %vm238_vm1, %v841_v19, 0.0 }
  0x19   : > { %v850_v26 = vunpack.c.l.bf16 %v743_v21  ;;  %v252_v27 = vsel %vm238_vm1, %v846_v23, 0.0  ;;  %v855_v30 = vunpack.c.h.bf16 %v743_v21  ;;  %v859_v33 = vunpack.c.l.bf16 %v744_v28 }
  0x1a   : > { %v243_v15 = vadd.f32 %v242_v10, %v241_v11  ;;  %v864_v37 = vunpack.c.h.bf16 %v744_v28  ;;  %v868_v40 = vunpack.c.l.bf16 %v745_v35  ;;  %v873_v44 = vunpack.c.h.bf16 %v745_v35 }
  0x1b   : > { %v254_v31 = vsel %vm238_vm1, %v850_v26, 0.0  ;;  %v256_v34 = vsel %vm238_vm1, %v855_v30, 0.0  ;;  %v258_v38 = vsel %vm238_vm1, %v859_v33, 0.0  ;;  %v877_v47 = vunpack.c.l.bf16 %v746_v42 }
  0x1c   : > { %v245_v18 = vadd.f32 %v244_v13, %v243_v15  ;;  %v260_v41 = vsel %vm238_vm1, %v864_v37, 0.0  ;;  %v262_v45 = vsel %vm238_vm1, %v868_v40, 0.0  ;;  %v264_v48 = vsel %vm238_vm1, %v873_v44, 0.0 }
  0x1d   : > { %v882_v51 = vunpack.c.h.bf16 %v746_v42  ;;  %v266_v52 = vsel %vm238_vm1, %v877_v47, 0.0  ;;  %v886_v54 = vunpack.c.l.bf16 %v747_v49  ;;  %v891_v58 = vunpack.c.h.bf16 %v747_v49 }
  0x1e   : > { %v247_v22 = vadd.f32 %v246_v17, %v245_v18  ;;  %v895_v61 = vunpack.c.l.bf16 %v748_v56  ;;  %v900_v1 = vunpack.c.h.bf16 %v748_v56  ;;  %v372_v6 = vmul.f32 %v817_v3, %v817_v3  ;;  %v750_v17 = vld [vmem:[%s810_s12 + $0x58] sm:$0xff]  }
  0x1f   : > { %v268_v55 = vsel %vm238_vm1, %v882_v51, 0.0  ;;  %v270_v59 = vsel %vm238_vm1, %v886_v54, 0.0  ;;  %v272_v62 = vsel %vm238_vm1, %v891_v58, 0.0  ;;  %v373_v8 = vmul.f32 %v819_v4, %v819_v4 }
  0x20   : > { %v249_v25 = vadd.f32 %v248_v20, %v247_v22  ;;  %v274_v2 = vsel %vm238_vm1, %v895_v61, 0.0  ;;  %v374_v10 = vmul.f32 %v821_v5, %v821_v5  ;;  %v910_v11 = vunpack.c.l.bf16 %v749_v63 }
  0x21   : > { %v276_v13 = vsel %vm238_vm1, %v900_v1, 0.0  ;;  %v375_v14 = vmul.f32 %v824_v7, %v824_v7  ;;  %v916_v15 = vunpack.c.h.bf16 %v749_v63  ;;  %v376_v18 = vmul.f32 %v832_v12, %v832_v12  ;;  %v751_v12 = vld [vmem:[%s810_s12 + $0x60] sm:$0xff]  }
  0x22   : > { %v251_v29 = vadd.f32 %v250_v24, %v249_v25  ;;  %v278_v4 = vsel %vm238_vm1, %v910_v11, 0.0  ;;  %v436_v5 = vsel %vm238_vm1, %v372_v6, 0.0  ;;  %v437_v20 = vsel %vm238_vm1, %v373_v8, 0.0 }
  0x23   : > { %v438_v22 = vadd.f32 %v437_v20, %v436_v5  ;;  %v439_v24 = vsel %vm238_vm1, %v374_v10, 0.0  ;;  %v926_v25 = vunpack.c.l.bf16 %v750_v17  ;;  %v280_v7 = vsel %vm238_vm1, %v916_v15, 0.0 }
  0x24   : > { %v253_v32 = vadd.f32 %v252_v27, %v251_v29  ;;  %v377_v27 = vmul.f32 %v837_v16, %v837_v16  ;;  %v441_v28 = vsel %vm238_vm1, %v375_v14, 0.0  ;;  %v378_v35 = vmul.f32 %v841_v19, %v841_v19 }
  0x25   : > { %v379_v42 = vmul.f32 %v846_v23, %v846_v23  ;;  %v949_v49 = vunpack.c.h.bf16 %v751_v12  ;;  %v384_v5 = vmul.f32 %v868_v40, %v868_v40 }
  0x26   : > { %v255_v36 = vadd.f32 %v254_v31, %v253_v32  ;;  %v440_v31 = vadd.f32 %v439_v24, %v438_v22  ;;  %v934_v32 = vunpack.c.h.bf16 %v750_v17  ;;  %v754_v17 = vld [vmem:[%s810_s12 + $0x78] sm:$0xff]  }
  0x27   : > { %v288_v23 = vsel %vm238_vm1, %v949_v49, 0.0  ;;  %v986_v24 = vunpack.c.l.bf16 %v754_v17 }
  0x28   : > { %v257_v39 = vadd.f32 %v256_v34, %v255_v36  ;;  %v282_v34 = vsel %vm238_vm1, %v926_v25, 0.0  ;;  %v443_v36 = vsel %vm238_vm1, %v376_v18, 0.0  ;;  %v284_v16 = vsel %vm238_vm1, %v934_v32, 0.0 }
  0x29   : > { %v298_v40 = vsel %vm238_vm1, %v986_v24, 0.0 }
  0x2a   : > { %v259_v43 = vadd.f32 %v258_v38, %v257_v39  ;;  %v442_v39 = vadd.f32 %v441_v28, %v440_v31  ;;  %v755_v28 = vld [vmem:[%s810_s12 + $0x80] sm:$0xff]   ;;  %v994_v31 = vunpack.c.h.bf16 %v754_v17 }
  0x2c   : > { %v261_v46 = vadd.f32 %v260_v41, %v259_v43  ;;  %v941_v41 = vunpack.c.l.bf16 %v751_v12  ;;  %v445_v43 = vsel %vm238_vm1, %v377_v27, 0.0 }
  0x2e   : > { %v263_v50 = vadd.f32 %v262_v45, %v261_v46  ;;  %v752_v45 = vld [vmem:[%s810_s12 + $0x68] sm:$0xff]   ;;  %v286_v19 = vsel %vm238_vm1, %v941_v41, 0.0 }
  0x2f   : > { %v956_v56 = vunpack.c.l.bf16 %v752_v45 }
  0x30   : > { %v265_v53 = vadd.f32 %v264_v48, %v263_v50  ;;  %v444_v48 = vadd.f32 %v443_v36, %v442_v39  ;;  %v380_v50 = vmul.f32 %v850_v26, %v850_v26  ;;  %v1001_v39 = vunpack.c.l.bf16 %v755_v28 }
  0x31   : > { %v290_v26 = vsel %vm238_vm1, %v956_v56, 0.0 }
  0x32   : > { %v267_v57 = vadd.f32 %v266_v52, %v265_v53  ;;  %v447_v52 = vsel %vm238_vm1, %v378_v35, 0.0  ;;  %v451_v6 = vsel %vm238_vm1, %v380_v50, 0.0  ;;  %v459_v35 = vsel %vm238_vm1, %v384_v5, 0.0 }
  0x34   : > { %v269_v60 = vadd.f32 %v268_v55, %v267_v57  ;;  %v446_v55 = vadd.f32 %v445_v43, %v444_v48  ;;  %v381_v57 = vmul.f32 %v855_v30, %v855_v30  ;;  %v756_v43 = vld [vmem:[%s810_s12 + $0x88] sm:$0xff]   ;;  %v1009_v48 = vunpack.c.h.bf16 %v755_v28 }
  0x36   : > { %v271_v0 = vadd.f32 %v270_v59, %v269_v60  ;;  %v449_v59 = vsel %vm238_vm1, %v379_v42, 0.0  ;;  %v753_v60 = vld [vmem:[%s810_s12 + $0x70] sm:$0xff]   ;;  %v448_v63 = vadd.f32 %v447_v52, %v446_v55  ;;  %v453_v14 = vsel %vm238_vm1, %v381_v57, 0.0 }
  0x37   : > { %v971_v10 = vunpack.c.l.bf16 %v753_v60  ;;  %v979_v18 = vunpack.c.h.bf16 %v753_v60  ;;  %v1016_v55 = vunpack.c.l.bf16 %v756_v43 }
  0x38   : > { %v273_v9 = vadd.f32 %v272_v62, %v271_v0  ;;  %v964_v0 = vunpack.c.h.bf16 %v752_v45 }
  0x3a   : > { %v275_v3 = vadd.f32 %v274_v2, %v273_v9  ;;  %v382_v2 = vmul.f32 %v859_v33, %v859_v33  ;;  %v450_v9 = vadd.f32 %v449_v59, %v448_v63  ;;  %v292_v30 = vsel %vm238_vm1, %v964_v0, 0.0  ;;  %v757_v59 = vld [vmem:[%s810_s12 + $0x90] sm:$0xff]  }
  0x3b   : > { %v294_v33 = vsel %vm238_vm1, %v971_v10, 0.0  ;;  %v1024_v63 = vunpack.c.h.bf16 %v756_v43 }
  0x3c   : > { %v277_v21 = vadd.f32 %v276_v13, %v275_v3  ;;  %v383_v13 = vmul.f32 %v864_v37, %v864_v37  ;;  %v455_v20 = vsel %vm238_vm1, %v382_v2, 0.0  ;;  %v296_v37 = vsel %vm238_vm1, %v979_v18, 0.0 }
  0x3e   : > { %v279_v29 = vadd.f32 %v278_v4, %v277_v21  ;;  %v452_v4 = vadd.f32 %v451_v6, %v450_v9  ;;  %v457_v27 = vsel %vm238_vm1, %v383_v13, 0.0  ;;  %v1031_v9 = vunpack.c.l.bf16 %v757_v59 }
  0x40   : > { %v281_v38 = vadd.f32 %v280_v7, %v279_v29  ;;  %v454_v22 = vadd.f32 %v453_v14, %v452_v4  ;;  %v385_v7 = vmul.f32 %v873_v44, %v873_v44  ;;  %v300_v44 = vsel %vm238_vm1, %v994_v31, 0.0  ;;  %v758_v14 = vld [vmem:[%s810_s12 + $0x98] sm:$0xff]  }
  0x41   : > { %v1039_v4 = vunpack.c.h.bf16 %v757_v59 }
  0x42   : > { %v283_v46 = vadd.f32 %v282_v34, %v281_v38  ;;  %v456_v29 = vadd.f32 %v455_v20, %v454_v22  ;;  %v386_v34 = vmul.f32 %v877_v47, %v877_v47  ;;  %v461_v42 = vsel %vm238_vm1, %v385_v7, 0.0 }
  0x43   : > { %v302_v47 = vsel %vm238_vm1, %v1001_v39, 0.0  ;;  %v1046_v22 = vunpack.c.l.bf16 %v758_v14 }
  0x44   : > { %v285_v53 = vadd.f32 %v284_v16, %v283_v46  ;;  %v458_v38 = vadd.f32 %v457_v27, %v456_v29  ;;  %v387_v16 = vmul.f32 %v882_v51, %v882_v51  ;;  %v463_v50 = vsel %vm238_vm1, %v386_v34, 0.0  ;;  %v759_v27 = vld [vmem:[%s810_s12 + $0xa0] sm:$0xff]  }
  0x45   : > { %v304_v51 = vsel %vm238_vm1, %v1009_v48, 0.0  ;;  %v1054_v29 = vunpack.c.h.bf16 %v758_v14 }
  0x46   : > { %v287_v62 = vadd.f32 %v286_v19, %v285_v53  ;;  %v460_v46 = vadd.f32 %v459_v35, %v458_v38  ;;  %v388_v19 = vmul.f32 %v886_v54, %v886_v54  ;;  %v465_v57 = vsel %vm238_vm1, %v387_v16, 0.0 }
  0x47   : > { %v306_v54 = vsel %vm238_vm1, %v1016_v55, 0.0  ;;  %v1061_v38 = vunpack.c.l.bf16 %v759_v27 }
  0x48   : > { %v289_v8 = vadd.f32 %v288_v23, %v287_v62  ;;  %v462_v53 = vadd.f32 %v461_v42, %v460_v46  ;;  %v389_v23 = vmul.f32 %v891_v58, %v891_v58  ;;  %v467_v2 = vsel %vm238_vm1, %v388_v19, 0.0  ;;  %v760_v42 = vld [vmem:[%s810_s12 + $0xa8] sm:$0xff]  }
  0x49   : > { %v308_v58 = vsel %vm238_vm1, %v1024_v63, 0.0  ;;  %v1069_v46 = vunpack.c.h.bf16 %v759_v27 }
  0x4a   : > { %v291_v3 = vadd.f32 %v290_v26, %v289_v8  ;;  %v464_v62 = vadd.f32 %v463_v50, %v462_v53  ;;  %v390_v26 = vmul.f32 %v895_v61, %v895_v61  ;;  %v469_v13 = vsel %vm238_vm1, %v389_v23, 0.0 }
  0x4b   : > { %v310_v61 = vsel %vm238_vm1, %v1031_v9, 0.0  ;;  %v1076_v53 = vunpack.c.l.bf16 %v760_v42 }
  0x4c   : > { %v293_v21 = vadd.f32 %v292_v30, %v291_v3  ;;  %v466_v8 = vadd.f32 %v465_v57, %v464_v62  ;;  %v391_v30 = vmul.f32 %v900_v1, %v900_v1  ;;  %v471_v5 = vsel %vm238_vm1, %v390_v26, 0.0  ;;  %v761_v57 = vld [vmem:[%s810_s12 + $0xb0] sm:$0xff]  }
  0x4d   : > { %v312_v1 = vsel %vm238_vm1, %v1039_v4, 0.0  ;;  %v1084_v62 = vunpack.c.h.bf16 %v760_v42 }
  0x4e   : > { %v295_v12 = vadd.f32 %v294_v33, %v293_v21  ;;  %v468_v3 = vadd.f32 %v467_v2, %v466_v8  ;;  %v392_v33 = vmul.f32 %v910_v11, %v910_v11  ;;  %v473_v7 = vsel %vm238_vm1, %v391_v30, 0.0 }
  0x4f   : > { %v314_v11 = vsel %vm238_vm1, %v1046_v22, 0.0  ;;  %v1091_v8 = vunpack.c.l.bf16 %v761_v57 }
  0x50   : > { %v297_v36 = vadd.f32 %v296_v37, %v295_v12  ;;  %v470_v21 = vadd.f32 %v469_v13, %v468_v3  ;;  %v393_v37 = vmul.f32 %v916_v15, %v916_v15  ;;  %v475_v34 = vsel %vm238_vm1, %v392_v33, 0.0  ;;  %v762_v13 = vld [vmem:[%s810_s12 + $0xb8] sm:$0xff]  }
  0x51   : > { %v316_v15 = vsel %vm238_vm1, %v1054_v29, 0.0  ;;  %v1099_v3 = vunpack.c.h.bf16 %v761_v57 }
  0x52   : > { %v299_v45 = vadd.f32 %v298_v40, %v297_v36  ;;  %v472_v12 = vadd.f32 %v471_v5, %v470_v21  ;;  %v394_v40 = vmul.f32 %v926_v25, %v926_v25  ;;  %v477_v16 = vsel %vm238_vm1, %v393_v37, 0.0 }
  0x53   : > { %v318_v25 = vsel %vm238_vm1, %v1061_v38, 0.0  ;;  %v1106_v21 = vunpack.c.l.bf16 %v762_v13 }
  0x54   : > { %v301_v52 = vadd.f32 %v300_v44, %v299_v45  ;;  %v474_v36 = vadd.f32 %v473_v7, %v472_v12  ;;  %v395_v44 = vmul.f32 %v934_v32, %v934_v32  ;;  %v479_v19 = vsel %vm238_vm1, %v394_v40, 0.0  ;;  %v763_v7 = vld [vmem:[%s810_s12 + $0xc0] sm:$0xff]  }
  0x55   : > { %v320_v32 = vsel %vm238_vm1, %v1069_v46, 0.0  ;;  %v1114_v12 = vunpack.c.h.bf16 %v762_v13 }
  0x56   : > { %v303_v60 = vadd.f32 %v302_v47, %v301_v52  ;;  %v476_v45 = vadd.f32 %v475_v34, %v474_v36  ;;  %v396_v47 = vmul.f32 %v941_v41, %v941_v41  ;;  %v481_v23 = vsel %vm238_vm1, %v395_v44, 0.0 }
  0x57   : > { %v322_v41 = vsel %vm238_vm1, %v1076_v53, 0.0  ;;  %v1121_v36 = vunpack.c.l.bf16 %v763_v7 }
  0x58   : > { %v305_v6 = vadd.f32 %v304_v51, %v303_v60  ;;  %v478_v52 = vadd.f32 %v477_v16, %v476_v45  ;;  %v397_v51 = vmul.f32 %v949_v49, %v949_v49  ;;  %v483_v26 = vsel %vm238_vm1, %v396_v47, 0.0  ;;  %v764_v16 = vld [vmem:[%s810_s12 + $0xc8] sm:$0xff]  }
  0x59   : > { %v324_v49 = vsel %vm238_vm1, %v1084_v62, 0.0  ;;  %v1129_v45 = vunpack.c.h.bf16 %v763_v7 }
  0x5a   : > { %v307_v17 = vadd.f32 %v306_v54, %v305_v6  ;;  %v480_v60 = vadd.f32 %v479_v19, %v478_v52  ;;  %v398_v54 = vmul.f32 %v956_v56, %v956_v56  ;;  %v485_v30 = vsel %vm238_vm1, %v397_v51, 0.0 }
  0x5b   : > { %v326_v56 = vsel %vm238_vm1, %v1091_v8, 0.0  ;;  %v1136_v52 = vunpack.c.l.bf16 %v764_v16 }
  0x5c   : > { %v309_v20 = vadd.f32 %v308_v58, %v307_v17  ;;  %v482_v6 = vadd.f32 %v481_v23, %v480_v60  ;;  %v399_v58 = vmul.f32 %v964_v0, %v964_v0  ;;  %v487_v33 = vsel %vm238_vm1, %v398_v54, 0.0  ;;  %v765_v23 = vld [vmem:[%s810_s12 + $0xd0] sm:$0xff]  }
  0x5d   : > { %v328_v0 = vsel %vm238_vm1, %v1099_v3, 0.0  ;;  %v1144_v60 = vunpack.c.h.bf16 %v764_v16  ;;  %v767_v16 = vld [vmem:[%s810_s12 + $0xe0] sm:$0xff]  }
  0x5e   : > { %v311_v28 = vadd.f32 %v310_v61, %v309_v20  ;;  %v484_v17 = vadd.f32 %v483_v26, %v482_v6  ;;  %v400_v61 = vmul.f32 %v971_v10, %v971_v10  ;;  %v489_v37 = vsel %vm238_vm1, %v399_v58, 0.0 }
  0x5f   : > { %v330_v10 = vsel %vm238_vm1, %v1106_v21, 0.0  ;;  %v1151_v6 = vunpack.c.l.bf16 %v765_v23 }
  0x60   : > { %v313_v35 = vadd.f32 %v312_v1, %v311_v28  ;;  %v486_v20 = vadd.f32 %v485_v30, %v484_v17  ;;  %v401_v1 = vmul.f32 %v979_v18, %v979_v18  ;;  %v491_v40 = vsel %vm238_vm1, %v400_v61, 0.0 }
  0x61   : > { %v332_v18 = vsel %vm238_vm1, %v1114_v12, 0.0 }
  0x62   : > { %v315_v43 = vadd.f32 %v314_v11, %v313_v35  ;;  %v488_v28 = vadd.f32 %v487_v33, %v486_v20  ;;  %v402_v11 = vmul.f32 %v986_v24, %v986_v24  ;;  %v493_v44 = vsel %vm238_vm1, %v401_v1, 0.0  ;;  %v766_v20 = vld [vmem:[%s810_s12 + $0xd8] sm:$0xff]  }
  0x63   : > { %v334_v24 = vsel %vm238_vm1, %v1121_v36, 0.0  ;;  %v1163_v33 = vunpack.c.h.bf16 %v765_v23  ;;  %v416_v23 = vmul.f32 %v1091_v8, %v1091_v8 }
  0x64   : > { %v317_v50 = vadd.f32 %v316_v15, %v315_v43  ;;  %v490_v35 = vadd.f32 %v489_v37, %v488_v28  ;;  %v403_v15 = vmul.f32 %v994_v31, %v994_v31  ;;  %v495_v47 = vsel %vm238_vm1, %v402_v11, 0.0 }
  0x65   : > { %v336_v31 = vsel %vm238_vm1, %v1129_v45, 0.0  ;;  %v344_v37 = vsel %vm238_vm1, %v1163_v33, 0.0  ;;  %v1174_v28 = vunpack.c.l.bf16 %v766_v20  ;;  %v523_v8 = vsel %vm238_vm1, %v416_v23, 0.0 }
  0x66   : > { %v319_v59 = vadd.f32 %v318_v25, %v317_v50  ;;  %v492_v43 = vadd.f32 %v491_v40, %v490_v35  ;;  %v404_v25 = vmul.f32 %v1001_v39, %v1001_v39  ;;  %v497_v51 = vsel %vm238_vm1, %v403_v15, 0.0 }
  0x67   : > { %v338_v39 = vsel %vm238_vm1, %v1136_v52, 0.0  ;;  %v412_v35 = vmul.f32 %v1061_v38, %v1061_v38  ;;  %v1184_v15 = vunpack.c.h.bf16 %v766_v20  ;;  %v414_v38 = vmul.f32 %v1076_v53, %v1076_v53  ;;  %v769_v20 = vld [vmem:[%s810_s12 + $0xf0] sm:$0xff]  }
  0x68   : > { %v321_v2 = vadd.f32 %v320_v32, %v319_v59  ;;  %v494_v50 = vadd.f32 %v493_v44, %v492_v43  ;;  %v405_v32 = vmul.f32 %v1009_v48, %v1009_v48  ;;  %v499_v54 = vsel %vm238_vm1, %v404_v25, 0.0 }
  0x69   : > { %v340_v48 = vsel %vm238_vm1, %v1144_v60, 0.0  ;;  %v413_v44 = vmul.f32 %v1069_v46, %v1069_v46  ;;  %v515_v25 = vsel %vm238_vm1, %v412_v35, 0.0  ;;  %v415_v46 = vmul.f32 %v1084_v62, %v1084_v62  ;;  %v768_v62 = vld [vmem:[%s810_s12 + $0xe8] sm:$0xff]  }
  0x6a   : > { %v323_v14 = vadd.f32 %v322_v41, %v321_v2  ;;  %v496_v59 = vadd.f32 %v495_v47, %v494_v50  ;;  %v406_v41 = vmul.f32 %v1016_v55, %v1016_v55  ;;  %v501_v58 = vsel %vm238_vm1, %v405_v32, 0.0 }
  0x6b   : > { %v342_v55 = vsel %vm238_vm1, %v1151_v6, 0.0  ;;  %v517_v50 = vsel %vm238_vm1, %v413_v44, 0.0  ;;  %v519_v53 = vsel %vm238_vm1, %v414_v38, 0.0  ;;  %v770_v44 = vld [vmem:[%s810_s12 + $0xf8] sm:$0xff]   ;;  %v427_v38 = vmul.f32 %v1184_v15, %v1184_v15 }
  0x6c   : > { %v325_v5 = vadd.f32 %v324_v49, %v323_v14  ;;  %v498_v2 = vadd.f32 %v497_v51, %v496_v59  ;;  %v407_v49 = vmul.f32 %v1024_v63, %v1024_v63  ;;  %v408_v14 = vmul.f32 %v1031_v9, %v1031_v9 }
  0x6d   : > { %v503_v17 = vsel %vm238_vm1, %v406_v41, 0.0  ;;  %v410_v9 = vmul.f32 %v1046_v22, %v1046_v22  ;;  %v727_v59 = vunpack.c.h.bf16 %v767_v16  ;;  %v521_v41 = vsel %vm238_vm1, %v415_v46, 0.0 }
  0x6e   : > { %v327_v27 = vadd.f32 %v326_v56, %v325_v5  ;;  %v500_v13 = vadd.f32 %v499_v54, %v498_v2  ;;  %v409_v5 = vmul.f32 %v1039_v4, %v1039_v4  ;;  %v505_v63 = vsel %vm238_vm1, %v407_v49, 0.0 }
  0x6f   : > { %v507_v7 = vsel %vm238_vm1, %v408_v14, 0.0  ;;  %v411_v4 = vmul.f32 %v1054_v29, %v1054_v29  ;;  %v511_v22 = vsel %vm238_vm1, %v410_v9, 0.0  ;;  %v352_v2 = vsel %vm238_vm1, %v727_v59, 0.0 }
  0x70   : > { %v329_v34 = vadd.f32 %v328_v0, %v327_v27  ;;  %v502_v61 = vadd.f32 %v501_v58, %v500_v13  ;;  %v730_v58 = vunpack.c.l.bf16 %v768_v62  ;;  %v545_v23 = vsel %vm238_vm1, %v427_v38, 0.0 }
  0x71   : > { %v513_v29 = vsel %vm238_vm1, %v411_v4, 0.0 }
  0x72   : > { %v331_v42 = vadd.f32 %v330_v10, %v329_v34  ;;  %v504_v1 = vadd.f32 %v503_v17, %v502_v61  ;;  %v509_v10 = vsel %vm238_vm1, %v409_v5, 0.0  ;;  %v346_v34 = vsel %vm238_vm1, %v1174_v28, 0.0 }
  0x73   : > { %v354_v14 = vsel %vm238_vm1, %v730_v58, 0.0  ;;  %v420_v17 = vmul.f32 %v1121_v36, %v1121_v36  ;;  %v421_v5 = vmul.f32 %v1129_v45, %v1129_v45 }
  0x74   : > { %v333_v19 = vadd.f32 %v332_v18, %v331_v42  ;;  %v506_v27 = vadd.f32 %v505_v63, %v504_v1 }
  0x75   : > { %v531_v36 = vsel %vm238_vm1, %v420_v17, 0.0  ;;  %v533_v45 = vsel %vm238_vm1, %v421_v5, 0.0 }
  0x76   : > { %v335_v57 = vadd.f32 %v334_v24, %v333_v19  ;;  %v508_v40 = vadd.f32 %v507_v7, %v506_v27  ;;  %v348_v24 = vsel %vm238_vm1, %v1184_v15, 0.0  ;;  %v1195_v19 = vunpack.c.l.bf16 %v767_v16 }
  0x77   : > { %v734_v7 = vunpack.c.l.bf16 %v769_v20  ;;  %v423_v27 = vmul.f32 %v1144_v60, %v1144_v60 }
  0x78   : > { %v337_v26 = vadd.f32 %v336_v31, %v335_v57  ;;  %v510_v18 = vadd.f32 %v509_v10, %v508_v40  ;;  %v350_v51 = vsel %vm238_vm1, %v1195_v19, 0.0  ;;  %v424_v40 = vmul.f32 %v1151_v6, %v1151_v6 }
  0x7a   : > { %v339_v30 = vadd.f32 %v338_v39, %v337_v26  ;;  %v512_v43 = vadd.f32 %v511_v22, %v510_v18  ;;  %v417_v39 = vmul.f32 %v1099_v3, %v1099_v3  ;;  %v425_v22 = vmul.f32 %v1163_v33, %v1163_v33 }
  0x7b   : > { %v537_v18 = vsel %vm238_vm1, %v423_v27, 0.0 }
  0x7c   : > { %v341_v56 = vadd.f32 %v340_v48, %v339_v30  ;;  %v514_v47 = vadd.f32 %v513_v29, %v512_v43  ;;  %v418_v48 = vmul.f32 %v1106_v21, %v1106_v21  ;;  %v419_v30 = vmul.f32 %v1114_v12, %v1114_v12 }
  0x7d   : > { %v525_v3 = vsel %vm238_vm1, %v417_v39, 0.0  ;;  %v731_v21 = vunpack.c.h.bf16 %v768_v62  ;;  %v539_v43 = vsel %vm238_vm1, %v424_v40, 0.0  ;;  %v430_v39 = vmul.f32 %v730_v58, %v730_v58  ;;  %v569_v40 = vld [vmem:[%s1270_s1] sm:$0x3] }
  0x7e   : > { %v343_v0 = vadd.f32 %v342_v55, %v341_v56  ;;  %v516_v32 = vadd.f32 %v515_v25, %v514_v47  ;;  %v527_v56 = vsel %vm238_vm1, %v418_v48, 0.0  ;;  %v529_v63 = vsel %vm238_vm1, %v419_v30, 0.0 }
  0x7f   : > { %v356_v1 = vsel %vm238_vm1, %v731_v21, 0.0  ;;  %v541_v25 = vsel %vm238_vm1, %v425_v22, 0.0  ;;  %v432_v48 = vmul.f32 %v734_v7, %v734_v7 }
  0x80   : > { %v345_v11 = vadd.f32 %v344_v37, %v343_v0  ;;  %v518_v57 = vadd.f32 %v517_v50, %v516_v32  ;;  %v422_v37 = vmul.f32 %v1136_v52, %v1136_v52  ;;  %v735_v52 = vunpack.c.h.bf16 %v769_v20 }
  0x81   : > { %v428_v50 = vmul.f32 %v1195_v19, %v1195_v19  ;;  %v555_v58 = vsel %vm238_vm1, %v432_v48, 0.0 }
  0x82   : > { %v347_v42 = vadd.f32 %v346_v34, %v345_v11  ;;  %v520_v26 = vadd.f32 %v519_v53, %v518_v57  ;;  %v358_v11 = vsel %vm238_vm1, %v734_v7, 0.0  ;;  %v535_v34 = vsel %vm238_vm1, %v422_v37, 0.0 }
  0x83   : > { %v360_v16 = vsel %vm238_vm1, %v735_v52, 0.0 }
  0x84   : > { %v349_v31 = vadd.f32 %v348_v24, %v347_v42  ;;  %v522_v49 = vadd.f32 %v521_v41, %v520_v26  ;;  %v426_v42 = vmul.f32 %v1174_v28, %v1174_v28  ;;  %v738_v24 = vunpack.c.l.bf16 %v770_v44 }
  0x85   : > { %v739_v28 = vunpack.c.h.bf16 %v770_v44  ;;  %v547_v41 = vsel %vm238_vm1, %v428_v50, 0.0 }
  0x86   : > { %v351_v54 = vadd.f32 %v350_v51, %v349_v31  ;;  %v524_v55 = vadd.f32 %v523_v8, %v522_v49  ;;  %v362_v46 = vsel %vm238_vm1, %v738_v24, 0.0  ;;  %v543_v31 = vsel %vm238_vm1, %v426_v42, 0.0 }
  0x87   : > { %v429_v51 = vmul.f32 %v727_v59, %v727_v59  ;;  %v364_v15 = vsel %vm238_vm1, %v739_v28, 0.0  ;;  %v551_v8 = vsel %vm238_vm1, %v430_v39, 0.0  ;;  %v433_v59 = vmul.f32 %v735_v52, %v735_v52 }
  0x88   : > { %v353_v13 = vadd.f32 %v352_v2, %v351_v54  ;;  %v526_v61 = vadd.f32 %v525_v3, %v524_v55  ;;  %v431_v54 = vmul.f32 %v731_v21, %v731_v21  ;;  %v434_v55 = vmul.f32 %v738_v24, %v738_v24 }
  0x89   : > { %v549_v26 = vsel %vm238_vm1, %v429_v51, 0.0  ;;  %v435_v17 = vmul.f32 %v739_v28, %v739_v28 }
  0x8a   : > { %v355_v12 = vadd.f32 %v354_v14, %v353_v13  ;;  %v528_v0 = vadd.f32 %v527_v56, %v526_v61  ;;  %v553_v30 = vsel %vm238_vm1, %v431_v54, 0.0  ;;  %v557_v56 = vsel %vm238_vm1, %v433_v59, 0.0 }
  0x8b   : > { %v559_v5 = vsel %vm238_vm1, %v434_v55, 0.0  ;;  %v561_v20 = vsel %vm238_vm1, %v435_v17, 0.0 }
  0x8c   : > { %v530_v9 = vadd.f32 %v529_v63, %v528_v0  ;;  %v357_v4 = vadd.f32 %v356_v1, %v355_v12 }
  0x8e   : > { %v532_v10 = vadd.f32 %v531_v36, %v530_v9  ;;  %v359_v60 = vadd.f32 %v358_v11, %v357_v4 }
  0x90   : > { %v534_v35 = vadd.f32 %v533_v45, %v532_v10  ;;  %v361_v33 = vadd.f32 %v360_v16, %v359_v60 }
  0x92   : > { %v536_v29 = vadd.f32 %v535_v34, %v534_v35  ;;  %v363_v53 = vadd.f32 %v362_v46, %v361_v33 }
  0x94   : > { %v538_v6 = vadd.f32 %v537_v18, %v536_v29  ;;  %v365_v2 = vadd.f32 %v364_v15, %v363_v53 }
  0x96   : > { %v540_v47 = vadd.f32 %v539_v43, %v538_v6  ;;  %v366_v3 = vrot.slane %v365_v2, 4 }
  0x98   : > { %v542_v32 = vadd.f32 %v541_v25, %v540_v47  ;;  %v367_v61 = vadd.f32 %v366_v3, %v365_v2 }
  0x9a   : > { %v544_v57 = vadd.f32 %v543_v31, %v542_v32  ;;  %v368_v12 = vrot.slane %v367_v61, 2 }
  0x9c   : > { %v546_v62 = vadd.f32 %v545_v23, %v544_v57  ;;  %v369_v37 = vadd.f32 %v368_v12, %v367_v61 }
  0x9e   : > { %v548_v19 = vadd.f32 %v547_v41, %v546_v62  ;;  %v370_v7 = vrot.slane %v369_v37, 1 }
  0xa0   : > { %v550_v49 = vadd.f32 %v549_v26, %v548_v19  ;;  %v371_v4 = vadd.f32 %v370_v7, %v369_v37 }
  0xa2   : > { %v552_v13 = vadd.f32 %v551_v8, %v550_v49 }
  0xa4   : > { %v554_v14 = vadd.f32 %v553_v30, %v552_v13 }
  0xa6   : > { %v556_v21 = vadd.f32 %v555_v58, %v554_v14 }
  0xa8   : > { %v558_v63 = vadd.f32 %v557_v56, %v556_v21 }
  0xaa   : > { %v560_v0 = vadd.f32 %v559_v5, %v558_v63 }
  0xac   : > { %v562_v1 = vadd.f32 %v561_v20, %v560_v0 }
  0xae   : > { %v563_v36 = vrot.slane %v562_v1, 4 }
  0xb0   : > { %v564_v9 = vadd.f32 %v563_v36, %v562_v1 }
  0xb2   : > { %v565_v27 = vrot.slane %v564_v9, 2 }
  0xb4   : > { %v566_v45 = vadd.f32 %v565_v27, %v564_v9 }
  0xb6   : > { %v567_v10 = vrot.slane %v566_v45, 1 }
  0xb8   : > { %v568_v11 = vadd.f32 %v567_v10, %v566_v45 }
  0xba   : > { %v571_v34 = vsel %vm570_vm2, %v371_v4, %v568_v11 }
  0xbb   : > { %v572_v35 = vadd.f32 %v571_v34, %v569_v40 }
  0xbd   : > { %574 = vst.msk [vmem:[%s1270_s1] sm:$0x3] %vm573_vm3, %v572_v35 }
  0xbe PF: > { %s11_s6 = sadd.s32 1, %s786_s6  }
  0xbf   : > { %p8_p5 = scmp.ge.s32.totalorder %s11_s6, 4  }
  0xc1   :  { %10 = sbr.rel (!%p8_p5) target bundleno = 1 (0x1), region = 54 }

// kernel: spatio_temporal_conv_forward.4
= control target key start
LH: loop header
LB: loop body
LE: loop exit
PB: predicated region body
PF: predicated region fallthrough
CT: control target
= control target key end

     0   :  { %s1814_s9 = smov 0   ;;  %s1816_s10 = smov 0   ;;  %s1946_s0 = inlined_call_operand.vmem [shape: bf16[1024,128], index: 0, kind: input, shape index: {}]   ;;  %s1947_s1 = inlined_call_operand.vmem [shape: bf16[128,128], index: 1, kind: input, shape index: {}]   ;;  %s1948_s2 = inlined_call_operand.vmem [shape: bf16[1024,128], index: 2, kind: output, shape index: {}]  }
   0x1   :  { %s1818_s11 = smov 0  }
   0x2 LB: > { %s24_s12 = sadd.s32 1, %s1793_s10  ;;  %p1209_p0 = scmp.ge.s32.totalorder %s1797_s11, 1  ;;  %s1797_s11 = sphi %s1818_s11, %s12_s11   ;;  %s1793_s10 = sphi %s1816_s10, %s1950_s10   ;;  %s1789_s9 = sphi %s1814_s9, %s1949_s9  }
   0x3   : > { %p26_p1 = scmp.ge.s32.totalorder %s24_s12, 2  ;;  %p136_p2 = scmp.lt.s32.totalorder %s1797_s11, 3 }
   0x5   : > { %s1952_s12 = smov (%p26_p1, %s24_s12), 0  ;;  %p137_p3 = pnand %p1209_p0, %p136_p2 }
   0x6   : > { %v1735_v0 = vld [vmem:[%s1947_s1] sm:$0xff] (!%p137_p3)   ;;  %s1210_s15 = sshll.u32 (!%p137_p3), %s1789_s9, 6  ;;  %v1736_v1 = vld [vmem:[%s1947_s1 + $0x8] sm:$0xff] (!%p137_p3)   ;;  %v1737_v2 = vld [vmem:[%s1947_s1 + $0x10] sm:$0xff] (!%p137_p3)  }
   0x7   : > { %140 = sbr.rel (%p137_p3) target bundleno = 313 (0x139), region = 28  ;;  %p166_p4 = scmp.lt.s32.totalorder (!%p137_p3), %s1210_s15, 127  ;;  %1615 = vmatprep.subr.bf16.mxu0 (!%p137_p3), %v1735_v0  ;;  %1695 = vmatprep.subr.bf16.mxu1 (!%p137_p3), %v1735_v0  ;;  %v1738_v3 = vld [vmem:[%s1947_s1 + $0x18] sm:$0xff] (!%p137_p3)   ;;  %v1739_v6 = vld [vmem:[%s1947_s1 + $0x20] sm:$0xff] (!%p137_p3)   ;;  %v1740_v7 = vld [vmem:[%s1947_s1 + $0x28] sm:$0xff] (!%p137_p3)  }
   0x8   : > { %1616 = vmatpush3.bf16.msra.mxu0 (!%p137_p3), %v1735_v0  ;;  %1703 = vmatpush3.bf16.msra.mxu1 (!%p137_p3), %v1735_v0  ;;  %v1741_v8 = vld [vmem:[%s1947_s1 + $0x30] sm:$0xff] (!%p137_p3)   ;;  %v1742_v9 = vld [vmem:[%s1947_s1 + $0x38] sm:$0xff] (!%p137_p3)  }
   0x9   : > { %1617 = vmatprep.subr.bf16.mxu0 (!%p137_p3), %v1736_v1  ;;  %1696 = vmatprep.subr.bf16.mxu1 (!%p137_p3), %v1736_v1 }
   0xc   : > { %1618 = vmatpush3.bf16.msra.mxu0 (!%p137_p3), %v1736_v1  ;;  %1704 = vmatpush3.bf16.msra.mxu1 (!%p137_p3), %v1736_v1 }
   0xd   : > { %1619 = vmatprep.subr.bf16.mxu0 (!%p137_p3), %v1737_v2  ;;  %1697 = vmatprep.subr.bf16.mxu1 (!%p137_p3), %v1737_v2 }
   0xe   : > { %s1954_s15 = smov (!%p166_p4, %s1210_s15), 127 }
   0xf   : > { %s1211_s20 = sshll.u32 %s1954_s15, 2 }
  0x10   : > { %s1849_s23 = scalar_lea.vmem %s1946_s0, %s1211_s20  ;;  %1620 = vmatpush3.bf16.msra.mxu0 %v1737_v2  ;;  %1705 = vmatpush3.bf16.msra.mxu1 %v1737_v2  ;;  %s1903_s8 = scalar_lea.vmem %s1948_s2, %s1211_s20 }
  0x11   : > { %v1743_v4 = vld [vmem:[%s1849_s23] sm:$0xff]   ;;  %1621 = vmatprep.subr.bf16.mxu0 %v1738_v3  ;;  %1698 = vmatprep.subr.bf16.mxu1 %v1738_v3  ;;  %v1745_v10 = vld [vmem:[%s1849_s23 + $0x8] sm:$0xff]   ;;  %v1747_v12 = vld [vmem:[%s1849_s23 + $0x10] sm:$0xff]  }
  0x12   : > { %v1744_v5 = vld [vmem:[%s1849_s23 + $0x80] sm:$0xff]   ;;  %1631 = vmatprep.mubr.bf16.mxu0 %v1743_v4  ;;  %v1746_v11 = vld [vmem:[%s1849_s23 + $0x88] sm:$0xff]   ;;  %v1748_v13 = vld [vmem:[%s1849_s23 + $0x90] sm:$0xff]  }
  0x13   : > { %1663 = vmatprep.mubr.bf16.mxu1 %v1744_v5  ;;  %v1749_v14 = vld [vmem:[%s1849_s23 + $0x18] sm:$0xff]   ;;  %v1751_v16 = vld [vmem:[%s1849_s23 + $0x20] sm:$0xff]   ;;  %v1753_v18 = vld [vmem:[%s1849_s23 + $0x28] sm:$0xff]  }
  0x14   : > { %1622 = vmatpush3.bf16.msra.mxu0 %v1738_v3  ;;  %1706 = vmatpush3.bf16.msra.mxu1 %v1738_v3  ;;  %v1750_v15 = vld [vmem:[%s1849_s23 + $0x98] sm:$0xff]   ;;  %v1752_v17 = vld [vmem:[%s1849_s23 + $0xa0] sm:$0xff]   ;;  %v1754_v19 = vld [vmem:[%s1849_s23 + $0xa8] sm:$0xff]  }
  0x15   : > { %1623 = vmatprep.subr.bf16.mxu0 %v1739_v6  ;;  %1699 = vmatprep.subr.bf16.mxu1 %v1739_v6  ;;  %v1755_v20 = vld [vmem:[%s1849_s23 + $0x30] sm:$0xff]   ;;  %v1757_v22 = vld [vmem:[%s1849_s23 + $0x38] sm:$0xff]   ;;  %v1759_v24 = vld [vmem:[%s1849_s23 + $0x40] sm:$0xff]  }
  0x16   : > { %v1756_v21 = vld [vmem:[%s1849_s23 + $0xb0] sm:$0xff]   ;;  %v1758_v23 = vld [vmem:[%s1849_s23 + $0xb8] sm:$0xff]   ;;  %v1760_v25 = vld [vmem:[%s1849_s23 + $0xc0] sm:$0xff]  }
  0x17   : > { %v1761_v26 = vld [vmem:[%s1849_s23 + $0x48] sm:$0xff]   ;;  %v1763_v28 = vld [vmem:[%s1849_s23 + $0x50] sm:$0xff]   ;;  %v1765_v30 = vld [vmem:[%s1849_s23 + $0x58] sm:$0xff]  }
  0x18   : > { %1624 = vmatpush3.bf16.msra.mxu0 %v1739_v6  ;;  %1707 = vmatpush3.bf16.msra.mxu1 %v1739_v6  ;;  %v1762_v27 = vld [vmem:[%s1849_s23 + $0xc8] sm:$0xff]   ;;  %v1764_v29 = vld [vmem:[%s1849_s23 + $0xd0] sm:$0xff]   ;;  %v1766_v31 = vld [vmem:[%s1849_s23 + $0xd8] sm:$0xff]  }
  0x19   : > { %1625 = vmatprep.subr.bf16.mxu0 %v1740_v7  ;;  %1700 = vmatprep.subr.bf16.mxu1 %v1740_v7  ;;  %v1767_v32 = vld [vmem:[%s1849_s23 + $0x60] sm:$0xff]   ;;  %v1769_v34 = vld [vmem:[%s1849_s23 + $0x68] sm:$0xff]   ;;  %v1771_v36 = vld [vmem:[%s1849_s23 + $0x70] sm:$0xff]  }
  0x1a   : > { %v1768_v33 = vld [vmem:[%s1849_s23 + $0xe0] sm:$0xff]   ;;  %v1770_v35 = vld [vmem:[%s1849_s23 + $0xe8] sm:$0xff]   ;;  %v1772_v37 = vld [vmem:[%s1849_s23 + $0xf0] sm:$0xff]  }
  0x1b   : > { %v1773_v38 = vld [vmem:[%s1849_s23 + $0x78] sm:$0xff]  }
  0x1c   : > { %1626 = vmatpush3.bf16.msra.mxu0 %v1740_v7  ;;  %1708 = vmatpush3.bf16.msra.mxu1 %v1740_v7  ;;  %v1774_v39 = vld [vmem:[%s1849_s23 + $0xf8] sm:$0xff]  }
  0x1d   : > { %1627 = vmatprep.subr.bf16.mxu0 %v1741_v8  ;;  %1701 = vmatprep.subr.bf16.mxu1 %v1741_v8 }
  0x20   : > { %1628 = vmatpush3.bf16.msra.mxu0 %v1741_v8  ;;  %1709 = vmatpush3.bf16.msra.mxu1 %v1741_v8 }
  0x21   : > { %1629 = vmatprep.subr.bf16.mxu0 %v1742_v9  ;;  %1702 = vmatprep.subr.bf16.mxu1 %v1742_v9 }
  0x24   : > { %1630 = vmatpush3.bf16.msra.mxu0 %v1742_v9  ;;  %1710 = vmatpush3.bf16.msra.mxu1 %v1742_v9 }
  0x27   : > { %1632 = vmatmul.mubr.bf16.vlgmr.msra.gmra.mrb[0].mxu0 %v1745_v10  ;;  %1664 = vmatmul.mubr.bf16.vlgmr.msra.gmra.mrb[0].mxu1 %v1746_v11 }
  0x28   : > { %1635 = vmatprep.mubr.bf16.mxu0 %v1747_v12  ;;  %1667 = vmatprep.mubr.bf16.mxu1 %v1748_v13 }
  0x2f   : > { %1636 = vmatmul.mubr.bf16.gmra.mrb[4].mxu0 %v1749_v14  ;;  %1668 = vmatmul.mubr.bf16.gmra.mrb[4].mxu1 %v1750_v15 }
  0x30   : > { %1639 = vmatprep.mubr.bf16.mxu0 %v1751_v16  ;;  %1671 = vmatprep.mubr.bf16.mxu1 %v1752_v17 }
  0x37   : > { %1640 = vmatmul.mubr.bf16.gmra.mrb[8].mxu0 %v1753_v18  ;;  %1672 = vmatmul.mubr.bf16.gmra.mrb[8].mxu1 %v1754_v19 }
  0x38   : > { %1643 = vmatprep.mubr.bf16.mxu0 %v1755_v20  ;;  %1675 = vmatprep.mubr.bf16.mxu1 %v1756_v21 }
  0x3f   : > { %1644 = vmatmul.mubr.bf16.gmra.mrb[12].mxu0 %v1757_v22  ;;  %1676 = vmatmul.mubr.bf16.gmra.mrb[12].mxu1 %v1758_v23 }
  0x40   : > { %1647 = vmatprep.mubr.bf16.mxu0 %v1759_v24  ;;  %1679 = vmatprep.mubr.bf16.mxu1 %v1760_v25 }
  0x47   : > { %1648 = vmatmul.mubr.bf16.gmra.mrb[16].mxu0 %v1761_v26  ;;  %1680 = vmatmul.mubr.bf16.gmra.mrb[16].mxu1 %v1762_v27 }
  0x48   : > { %1651 = vmatprep.mubr.bf16.mxu0 %v1763_v28  ;;  %1683 = vmatprep.mubr.bf16.mxu1 %v1764_v29 }
  0x4f   : > { %1652 = vmatmul.mubr.bf16.gmra.mrb[20].mxu0 %v1765_v30  ;;  %1684 = vmatmul.mubr.bf16.gmra.mrb[20].mxu1 %v1766_v31 }
  0x50   : > { %1655 = vmatprep.mubr.bf16.mxu0 %v1767_v32  ;;  %1687 = vmatprep.mubr.bf16.mxu1 %v1768_v33 }
  0x57   : > { %1656 = vmatmul.mubr.bf16.gmra.mrb[24].mxu0 %v1769_v34  ;;  %1688 = vmatmul.mubr.bf16.gmra.mrb[24].mxu1 %v1770_v35 }
  0x58   : > { %1659 = vmatprep.mubr.bf16.mxu0 %v1771_v36  ;;  %1691 = vmatprep.mubr.bf16.mxu1 %v1772_v37 }
  0x5f   : > { %1660 = vmatmul.mubr.bf16.gmra.mrb[28].mxu0 %v1773_v38  ;;  %1692 = vmatmul.mubr.bf16.gmra.mrb[28].mxu1 %v1774_v39 }
  0xfa   : > { %v1633_v40 = vpop.f32.mrb[0].mxu0  ;;  %v1665_v41 = vpop.f32.mrb[0].mxu1 }
  0xfb   : > { %v539_v42 = vpop.f32.mrb[1].mxu0  ;;  %v667_v43 = vpop.f32.mrb[1].mxu1 }
  0xfc   : > { %v1634_v44 = vpop.f32.mrb[2].mxu0  ;;  %v1666_v45 = vpop.f32.mrb[2].mxu1 }
  0xfd   : > { %v1392_v46 = vpack.c.bf16 %v1634_v44, %v1633_v40  ;;  %v1472_v47 = vpack.c.bf16 %v1666_v45, %v1665_v41  ;;  %v542_v48 = vpop.f32.mrb[3].mxu0  ;;  %v670_v49 = vpop.f32.mrb[3].mxu1 }
  0xfe   : > { %v1387_v50 = vpack.c.bf16 %v542_v48, %v539_v42  ;;  %v1467_v51 = vpack.c.bf16 %v670_v49, %v667_v43 }
  0xff   : > { %1544 = vst [vmem:[%s1903_s8 + $0x8] sm:$0xff] %v1392_v46   ;;  %1560 = vst [vmem:[%s1903_s8 + $0x88] sm:$0xff] %v1472_v47  }
 0x100   : > { %1388 = vst [vmem:[%s1903_s8] sm:$0xff] %v1387_v50   ;;  %1559 = vst [vmem:[%s1903_s8 + $0x80] sm:$0xff] %v1467_v51  }
 0x102   : > { %v1637_v52 = vpop.f32.mrb[4].mxu0  ;;  %v1669_v53 = vpop.f32.mrb[4].mxu1 }
 0x103   : > { %v555_v54 = vpop.f32.mrb[5].mxu0  ;;  %v683_v55 = vpop.f32.mrb[5].mxu1 }
 0x104   : > { %v1638_v56 = vpop.f32.mrb[6].mxu0  ;;  %v1670_v57 = vpop.f32.mrb[6].mxu1 }
 0x105   : > { %v1402_v58 = vpack.c.bf16 %v1638_v56, %v1637_v52  ;;  %v1482_v59 = vpack.c.bf16 %v1670_v57, %v1669_v53  ;;  %v558_v60 = vpop.f32.mrb[7].mxu0  ;;  %v686_v61 = vpop.f32.mrb[7].mxu1 }
 0x106   : > { %v1397_v62 = vpack.c.bf16 %v558_v60, %v555_v54  ;;  %v1477_v63 = vpack.c.bf16 %v686_v61, %v683_v55 }
 0x107   : > { %1546 = vst [vmem:[%s1903_s8 + $0x18] sm:$0xff] %v1402_v58   ;;  %1562 = vst [vmem:[%s1903_s8 + $0x98] sm:$0xff] %v1482_v59  }
 0x108   : > { %1545 = vst [vmem:[%s1903_s8 + $0x10] sm:$0xff] %v1397_v62   ;;  %1561 = vst [vmem:[%s1903_s8 + $0x90] sm:$0xff] %v1477_v63  }
 0x10a   : > { %v1641_v0 = vpop.f32.mrb[8].mxu0  ;;  %v1673_v1 = vpop.f32.mrb[8].mxu1 }
 0x10b   : > { %v571_v2 = vpop.f32.mrb[9].mxu0  ;;  %v699_v3 = vpop.f32.mrb[9].mxu1 }
 0x10c   : > { %v1642_v4 = vpop.f32.mrb[10].mxu0  ;;  %v1674_v5 = vpop.f32.mrb[10].mxu1 }
 0x10d   : > { %v1412_v6 = vpack.c.bf16 %v1642_v4, %v1641_v0  ;;  %v1492_v7 = vpack.c.bf16 %v1674_v5, %v1673_v1  ;;  %v574_v8 = vpop.f32.mrb[11].mxu0  ;;  %v702_v9 = vpop.f32.mrb[11].mxu1 }
 0x10e   : > { %v1407_v10 = vpack.c.bf16 %v574_v8, %v571_v2  ;;  %v1487_v11 = vpack.c.bf16 %v702_v9, %v699_v3 }
 0x10f   : > { %1548 = vst [vmem:[%s1903_s8 + $0x28] sm:$0xff] %v1412_v6   ;;  %1564 = vst [vmem:[%s1903_s8 + $0xa8] sm:$0xff] %v1492_v7  }
 0x110   : > { %1547 = vst [vmem:[%s1903_s8 + $0x20] sm:$0xff] %v1407_v10   ;;  %1563 = vst [vmem:[%s1903_s8 + $0xa0] sm:$0xff] %v1487_v11  }
 0x112   : > { %v1645_v12 = vpop.f32.mrb[12].mxu0  ;;  %v1677_v13 = vpop.f32.mrb[12].mxu1 }
 0x113   : > { %v587_v14 = vpop.f32.mrb[13].mxu0  ;;  %v715_v15 = vpop.f32.mrb[13].mxu1 }
 0x114   : > { %v1646_v16 = vpop.f32.mrb[14].mxu0  ;;  %v1678_v17 = vpop.f32.mrb[14].mxu1 }
 0x115   : > { %v1422_v18 = vpack.c.bf16 %v1646_v16, %v1645_v12  ;;  %v1502_v19 = vpack.c.bf16 %v1678_v17, %v1677_v13  ;;  %v590_v20 = vpop.f32.mrb[15].mxu0  ;;  %v718_v21 = vpop.f32.mrb[15].mxu1 }
 0x116   : > { %v1417_v22 = vpack.c.bf16 %v590_v20, %v587_v14  ;;  %v1497_v23 = vpack.c.bf16 %v718_v21, %v715_v15 }
 0x117   : > { %1550 = vst [vmem:[%s1903_s8 + $0x38] sm:$0xff] %v1422_v18   ;;  %1566 = vst [vmem:[%s1903_s8 + $0xb8] sm:$0xff] %v1502_v19  }
 0x118   : > { %1549 = vst [vmem:[%s1903_s8 + $0x30] sm:$0xff] %v1417_v22   ;;  %1565 = vst [vmem:[%s1903_s8 + $0xb0] sm:$0xff] %v1497_v23  }
 0x11a   : > { %v1649_v24 = vpop.f32.mrb[16].mxu0  ;;  %v1681_v25 = vpop.f32.mrb[16].mxu1 }
 0x11b   : > { %v603_v26 = vpop.f32.mrb[17].mxu0  ;;  %v731_v27 = vpop.f32.mrb[17].mxu1 }
 0x11c   : > { %v1650_v28 = vpop.f32.mrb[18].mxu0  ;;  %v1682_v29 = vpop.f32.mrb[18].mxu1 }
 0x11d   : > { %v1432_v30 = vpack.c.bf16 %v1650_v28, %v1649_v24  ;;  %v1512_v31 = vpack.c.bf16 %v1682_v29, %v1681_v25  ;;  %v606_v32 = vpop.f32.mrb[19].mxu0  ;;  %v734_v33 = vpop.f32.mrb[19].mxu1 }
 0x11e   : > { %v1427_v34 = vpack.c.bf16 %v606_v32, %v603_v26  ;;  %v1507_v35 = vpack.c.bf16 %v734_v33, %v731_v27 }
 0x11f   : > { %1552 = vst [vmem:[%s1903_s8 + $0x48] sm:$0xff] %v1432_v30   ;;  %1568 = vst [vmem:[%s1903_s8 + $0xc8] sm:$0xff] %v1512_v31  }
 0x120   : > { %1551 = vst [vmem:[%s1903_s8 + $0x40] sm:$0xff] %v1427_v34   ;;  %1567 = vst [vmem:[%s1903_s8 + $0xc0] sm:$0xff] %v1507_v35  }
 0x122   : > { %v1653_v36 = vpop.f32.mrb[20].mxu0  ;;  %v1685_v37 = vpop.f32.mrb[20].mxu1 }
 0x123   : > { %v619_v38 = vpop.f32.mrb[21].mxu0  ;;  %v747_v39 = vpop.f32.mrb[21].mxu1 }
 0x124   : > { %v1654_v40 = vpop.f32.mrb[22].mxu0  ;;  %v1686_v41 = vpop.f32.mrb[22].mxu1 }
 0x125   : > { %v1442_v42 = vpack.c.bf16 %v1654_v40, %v1653_v36  ;;  %v1522_v43 = vpack.c.bf16 %v1686_v41, %v1685_v37  ;;  %v622_v44 = vpop.f32.mrb[23].mxu0  ;;  %v750_v45 = vpop.f32.mrb[23].mxu1 }
 0x126   : > { %v1437_v46 = vpack.c.bf16 %v622_v44, %v619_v38  ;;  %v1517_v47 = vpack.c.bf16 %v750_v45, %v747_v39 }
 0x127   : > { %1554 = vst [vmem:[%s1903_s8 + $0x58] sm:$0xff] %v1442_v42   ;;  %1570 = vst [vmem:[%s1903_s8 + $0xd8] sm:$0xff] %v1522_v43  }
 0x128   : > { %1553 = vst [vmem:[%s1903_s8 + $0x50] sm:$0xff] %v1437_v46   ;;  %1569 = vst [vmem:[%s1903_s8 + $0xd0] sm:$0xff] %v1517_v47  }
 0x12a   : > { %v1657_v48 = vpop.f32.mrb[24].mxu0  ;;  %v1689_v49 = vpop.f32.mrb[24].mxu1 }
 0x12b   : > { %v635_v50 = vpop.f32.mrb[25].mxu0  ;;  %v763_v51 = vpop.f32.mrb[25].mxu1 }
 0x12c   : > { %v1658_v52 = vpop.f32.mrb[26].mxu0  ;;  %v1690_v53 = vpop.f32.mrb[26].mxu1 }
 0x12d   : > { %v1452_v54 = vpack.c.bf16 %v1658_v52, %v1657_v48  ;;  %v1532_v55 = vpack.c.bf16 %v1690_v53, %v1689_v49  ;;  %v638_v56 = vpop.f32.mrb[27].mxu0  ;;  %v766_v57 = vpop.f32.mrb[27].mxu1 }
 0x12e   : > { %v1447_v58 = vpack.c.bf16 %v638_v56, %v635_v50  ;;  %v1527_v59 = vpack.c.bf16 %v766_v57, %v763_v51 }
 0x12f   : > { %1556 = vst [vmem:[%s1903_s8 + $0x68] sm:$0xff] %v1452_v54   ;;  %1572 = vst [vmem:[%s1903_s8 + $0xe8] sm:$0xff] %v1532_v55  }
 0x130   : > { %1555 = vst [vmem:[%s1903_s8 + $0x60] sm:$0xff] %v1447_v58   ;;  %1571 = vst [vmem:[%s1903_s8 + $0xe0] sm:$0xff] %v1527_v59  }
 0x132   : > { %v1661_v60 = vpop.f32.mrb[28].mxu0  ;;  %v1693_v61 = vpop.f32.mrb[28].mxu1 }
 0x133   : > { %v651_v62 = vpop.f32.mrb[29].mxu0  ;;  %v779_v63 = vpop.f32.mrb[29].mxu1 }
 0x134   : > { %v1662_v0 = vpop.f32.mrb[30].mxu0  ;;  %v1694_v1 = vpop.f32.mrb[30].mxu1 }
 0x135   : > { %v1462_v2 = vpack.c.bf16 %v1662_v0, %v1661_v60  ;;  %v1542_v3 = vpack.c.bf16 %v1694_v1, %v1693_v61  ;;  %v654_v4 = vpop.f32.mrb[31].mxu0  ;;  %v782_v5 = vpop.f32.mrb[31].mxu1 }
 0x136   : > { %v1457_v6 = vpack.c.bf16 %v654_v4, %v651_v62  ;;  %v1537_v7 = vpack.c.bf16 %v782_v5, %v779_v63 }
 0x137   : > { %1558 = vst [vmem:[%s1903_s8 + $0x78] sm:$0xff] %v1462_v2   ;;  %1574 = vst [vmem:[%s1903_s8 + $0xf8] sm:$0xff] %v1542_v3  }
 0x138   : > { %1557 = vst [vmem:[%s1903_s8 + $0x70] sm:$0xff] %v1457_v6   ;;  %1573 = vst [vmem:[%s1903_s8 + $0xf0] sm:$0xff] %v1537_v7  }
 0x139 PF: > { %s12_s11 = sadd.s32 1, %s1797_s11   ;;  %s1949_s9 = smov %s1793_s10 }
 0x13a   : > { %p9_p5 = scmp.ge.s32.totalorder %s12_s11, 4   ;;  %s1950_s10 = smov %s1952_s12 }
 0x13c   :  { %11 = sbr.rel (!%p9_p5) target bundleno = 2 (0x2), region = 61 }

// kernel: spatio_temporal_conv_forward.6
= control target key start
LH: loop header
LB: loop body
LE: loop exit
PB: predicated region body
PF: predicated region fallthrough
CT: control target
= control target key end

     0   :  { %s1221_s12 = smov 0   ;;  %s1547_s0 = inlined_call_operand.vmem [shape: bf16[1024,26], index: 0, kind: input, shape index: {}]   ;;  %s1548_s1 = inlined_call_operand.vmem [shape: f32[1,26], index: 1, kind: input, shape index: {}]   ;;  %s1549_s2 = inlined_call_operand.vmem [shape: f32[1,26], index: 2, kind: input, shape index: {}]   ;;  %s1550_s3 = inlined_call_operand.vmem [shape: bf16[1024,26], index: 3, kind: output, shape index: {}]  }
   0x1 LB: > { %s885_s13 = sadd.s32 4294967295, %s1199_s12   ;;  %p889_p0 = scmp.ge.s32.totalorder %s1199_s12, 1  ;;  %s1199_s12 = sphi %s1221_s12, %s13_s12  }
   0x2   : > { %p138_p1 = scmp.lt.s32.totalorder %s1199_s12, 3 }
   0x4   : > { %p139_p2 = pnand %p889_p0, %p138_p1 }
   0x5   : > { %s890_s14 = sshll.u32 (!%p139_p2), %s885_s13, 6  ;;  %v1242_v0 = vld [vmem:[%s1548_s1] ss:$0 sm:$0xff] (!%p139_p2)  ;;  %vm764_vm0 = vcmask (!%p139_p2), 207872  }
   0x6   : > { %142 = sbr.rel (%p139_p2) target bundleno = 101 (0x65), region = 32  ;;  %p163_p3 = scmp.lt.s32.totalorder (!%p139_p2), %s890_s14, 127  ;;  %v1251_v9 = vld [vmem:[%s1549_s2] ss:$0 sm:$0xff] (!%p139_p2) }
   0xd   : > { %s1552_s14 = smov (!%p163_p3, %s890_s14), 127 }
   0xe   : > { %s891_s15 = sshll.u32 %s1552_s14, 2 }
   0xf   : > { %s1237_s18 = scalar_lea.vmem %s1547_s0, %s891_s15  ;;  %s1274_s25 = scalar_lea.vmem %s1550_s3, %s891_s15 }
  0x10   : > { %v1027_v1 = vld [vmem:[%s1237_s18] sm:$0xff]   ;;  %v1154_v2 = vld [vmem:[%s1237_s18 + $0x8] sm:$0xff]   ;;  %v1155_v3 = vld [vmem:[%s1237_s18 + $0x10] sm:$0xff]  }
  0x11   : > { %v1028_v4 = vunpack.c.l.bf16 %v1027_v1  ;;  %v1029_v5 = vunpack.c.h.bf16 %v1027_v1  ;;  %v1032_v6 = vunpack.c.l.bf16 %v1154_v2  ;;  %v1033_v7 = vunpack.c.h.bf16 %v1154_v2  ;;  %v1156_v8 = vld [vmem:[%s1237_s18 + $0x18] sm:$0xff]   ;;  %v1157_v38 = vld [vmem:[%s1237_s18 + $0x20] sm:$0xff]   ;;  %v1158_v39 = vld [vmem:[%s1237_s18 + $0x28] sm:$0xff]  }
  0x12   : > { %v1036_v10 = vunpack.c.l.bf16 %v1155_v3  ;;  %v1037_v11 = vunpack.c.h.bf16 %v1155_v3  ;;  %v1040_v12 = vunpack.c.l.bf16 %v1156_v8  ;;  %v1041_v13 = vunpack.c.h.bf16 %v1156_v8  ;;  %v1159_v44 = vld [vmem:[%s1237_s18 + $0x30] sm:$0xff]   ;;  %v1160_v45 = vld [vmem:[%s1237_s18 + $0x38] sm:$0xff]  }
  0x13   : > { %v309_v14 = vmul.f32 %v1028_v4, %v1242_v0  ;;  %v310_v15 = vmul.f32 %v1029_v5, %v1242_v0  ;;  %v311_v16 = vmul.f32 %v1032_v6, %v1242_v0  ;;  %v312_v17 = vmul.f32 %v1033_v7, %v1242_v0 }
  0x14   : > { %v313_v18 = vmul.f32 %v1036_v10, %v1242_v0  ;;  %v314_v19 = vmul.f32 %v1037_v11, %v1242_v0  ;;  %v315_v20 = vmul.f32 %v1040_v12, %v1242_v0  ;;  %v316_v21 = vmul.f32 %v1041_v13, %v1242_v0 }
  0x15   : > { %v380_v22 = vadd.f32 %v1251_v9, %v309_v14  ;;  %v381_v23 = vadd.f32 %v1251_v9, %v310_v15  ;;  %v382_v24 = vadd.f32 %v1251_v9, %v311_v16  ;;  %v383_v25 = vadd.f32 %v1251_v9, %v312_v17 }
  0x16   : > { %v384_v26 = vadd.f32 %v1251_v9, %v313_v18  ;;  %v385_v27 = vadd.f32 %v1251_v9, %v314_v19  ;;  %v386_v28 = vadd.f32 %v1251_v9, %v315_v20  ;;  %v387_v29 = vadd.f32 %v1251_v9, %v316_v21  ;;  %v1161_v20 = vld [vmem:[%s1237_s18 + $0x40] sm:$0xff]   ;;  %v1162_v21 = vld [vmem:[%s1237_s18 + $0x48] sm:$0xff]  }
  0x17   : > { %v444_v30 = vmax.f32 %v380_v22, 0.0  ;;  %v445_v31 = vmax.f32 %v381_v23, 0.0  ;;  %v446_v32 = vmax.f32 %v382_v24, 0.0  ;;  %v447_v33 = vmax.f32 %v383_v25, 0.0 }
  0x18   : > { %v448_v34 = vmax.f32 %v384_v26, 0.0  ;;  %v449_v35 = vmax.f32 %v385_v27, 0.0  ;;  %v450_v36 = vmax.f32 %v386_v28, 0.0  ;;  %v451_v37 = vmax.f32 %v387_v29, 0.0  ;;  %v1163_v26 = vld [vmem:[%s1237_s18 + $0x50] sm:$0xff]   ;;  %v1164_v27 = vld [vmem:[%s1237_s18 + $0x58] sm:$0xff]  }
  0x19   : > { %v962_v40 = vpack.c.bf16 %v444_v30, %v444_v30  ;;  %v963_v41 = vpack.c.bf16 %v445_v31, %v445_v31  ;;  %v964_v42 = vpack.c.bf16 %v446_v32, %v446_v32  ;;  %v965_v43 = vpack.c.bf16 %v447_v33, %v447_v33 }
  0x1a   : > { %v966_v46 = vpack.c.bf16 %v448_v34, %v448_v34  ;;  %v967_v47 = vpack.c.bf16 %v449_v35, %v449_v35  ;;  %v968_v48 = vpack.c.bf16 %v450_v36, %v450_v36  ;;  %v969_v49 = vpack.c.bf16 %v451_v37, %v451_v37 }
  0x1b   : > { %765 = vst.msk [vmem:[%s1274_s25] sm:$0xf] %vm764_vm0, %v962_v40  ;;  %766 = vst.msk [vmem:[%s1274_s25 + $0x4] sm:$0xf] %vm764_vm0, %v963_v41  ;;  %v1044_v50 = vunpack.c.l.bf16 %v1157_v38  ;;  %v1045_v51 = vunpack.c.h.bf16 %v1157_v38  ;;  %v1048_v52 = vunpack.c.l.bf16 %v1158_v39  ;;  %v1049_v53 = vunpack.c.h.bf16 %v1158_v39 }
  0x1c   : > { %767 = vst.msk [vmem:[%s1274_s25 + $0x8] sm:$0xf] %vm764_vm0, %v964_v42  ;;  %768 = vst.msk [vmem:[%s1274_s25 + $0xc] sm:$0xf] %vm764_vm0, %v965_v43  ;;  %v1052_v54 = vunpack.c.l.bf16 %v1159_v44  ;;  %v1053_v55 = vunpack.c.h.bf16 %v1159_v44  ;;  %v1056_v56 = vunpack.c.l.bf16 %v1160_v45  ;;  %v1057_v57 = vunpack.c.h.bf16 %v1160_v45 }
  0x1d   : > { %769 = vst.msk [vmem:[%s1274_s25 + $0x10] sm:$0xf] %vm764_vm0, %v966_v46  ;;  %770 = vst.msk [vmem:[%s1274_s25 + $0x14] sm:$0xf] %vm764_vm0, %v967_v47  ;;  %v317_v58 = vmul.f32 %v1044_v50, %v1242_v0  ;;  %v318_v59 = vmul.f32 %v1045_v51, %v1242_v0  ;;  %v319_v60 = vmul.f32 %v1048_v52, %v1242_v0  ;;  %v1060_v32 = vunpack.c.l.bf16 %v1161_v20 }
  0x1e   : > { %771 = vst.msk [vmem:[%s1274_s25 + $0x18] sm:$0xf] %vm764_vm0, %v968_v48  ;;  %772 = vst.msk [vmem:[%s1274_s25 + $0x1c] sm:$0xf] %vm764_vm0, %v969_v49  ;;  %v320_v61 = vmul.f32 %v1049_v53, %v1242_v0  ;;  %v321_v62 = vmul.f32 %v1052_v54, %v1242_v0  ;;  %v322_v63 = vmul.f32 %v1053_v55, %v1242_v0  ;;  %v1061_v33 = vunpack.c.h.bf16 %v1161_v20 }
  0x1f   : > { %v323_v1 = vmul.f32 %v1056_v56, %v1242_v0  ;;  %v324_v2 = vmul.f32 %v1057_v57, %v1242_v0  ;;  %v388_v3 = vadd.f32 %v1251_v9, %v317_v58  ;;  %v389_v4 = vadd.f32 %v1251_v9, %v318_v59 }
  0x20   : > { %v390_v5 = vadd.f32 %v1251_v9, %v319_v60  ;;  %v391_v6 = vadd.f32 %v1251_v9, %v320_v61  ;;  %v392_v7 = vadd.f32 %v1251_v9, %v321_v62  ;;  %v393_v8 = vadd.f32 %v1251_v9, %v322_v63 }
  0x21   : > { %v394_v10 = vadd.f32 %v1251_v9, %v323_v1  ;;  %v395_v11 = vadd.f32 %v1251_v9, %v324_v2  ;;  %v452_v12 = vmax.f32 %v388_v3, 0.0  ;;  %v453_v13 = vmax.f32 %v389_v4, 0.0  ;;  %v1165_v1 = vld [vmem:[%s1237_s18 + $0x60] sm:$0xff]   ;;  %v1166_v2 = vld [vmem:[%s1237_s18 + $0x68] sm:$0xff]  }
  0x22   : > { %v454_v14 = vmax.f32 %v390_v5, 0.0  ;;  %v455_v15 = vmax.f32 %v391_v6, 0.0  ;;  %v456_v16 = vmax.f32 %v392_v7, 0.0  ;;  %v457_v17 = vmax.f32 %v393_v8, 0.0  ;;  %v1167_v7 = vld [vmem:[%s1237_s18 + $0x70] sm:$0xff]   ;;  %v1168_v8 = vld [vmem:[%s1237_s18 + $0x78] sm:$0xff]  }
  0x23   : > { %v458_v18 = vmax.f32 %v394_v10, 0.0  ;;  %v459_v19 = vmax.f32 %v395_v11, 0.0  ;;  %v970_v22 = vpack.c.bf16 %v452_v12, %v452_v12  ;;  %v971_v23 = vpack.c.bf16 %v453_v13, %v453_v13 }
  0x24   : > { %v972_v24 = vpack.c.bf16 %v454_v14, %v454_v14  ;;  %v973_v25 = vpack.c.bf16 %v455_v15, %v455_v15  ;;  %v974_v28 = vpack.c.bf16 %v456_v16, %v456_v16  ;;  %v975_v29 = vpack.c.bf16 %v457_v17, %v457_v17 }
  0x25   : > { %v976_v30 = vpack.c.bf16 %v458_v18, %v458_v18  ;;  %v977_v31 = vpack.c.bf16 %v459_v19, %v459_v19  ;;  %773 = vst.msk [vmem:[%s1274_s25 + $0x20] sm:$0xf] %vm764_vm0, %v970_v22  ;;  %774 = vst.msk [vmem:[%s1274_s25 + $0x24] sm:$0xf] %vm764_vm0, %v971_v23  ;;  %v1064_v34 = vunpack.c.l.bf16 %v1162_v21  ;;  %v1065_v35 = vunpack.c.h.bf16 %v1162_v21 }
  0x26   : > { %775 = vst.msk [vmem:[%s1274_s25 + $0x28] sm:$0xf] %vm764_vm0, %v972_v24  ;;  %776 = vst.msk [vmem:[%s1274_s25 + $0x2c] sm:$0xf] %vm764_vm0, %v973_v25  ;;  %v1068_v36 = vunpack.c.l.bf16 %v1163_v26  ;;  %v1069_v37 = vunpack.c.h.bf16 %v1163_v26  ;;  %v1072_v38 = vunpack.c.l.bf16 %v1164_v27  ;;  %v1073_v39 = vunpack.c.h.bf16 %v1164_v27 }
  0x27   : > { %777 = vst.msk [vmem:[%s1274_s25 + $0x30] sm:$0xf] %vm764_vm0, %v974_v28  ;;  %778 = vst.msk [vmem:[%s1274_s25 + $0x34] sm:$0xf] %vm764_vm0, %v975_v29  ;;  %v325_v40 = vmul.f32 %v1060_v32, %v1242_v0  ;;  %v326_v41 = vmul.f32 %v1061_v33, %v1242_v0  ;;  %v327_v42 = vmul.f32 %v1064_v34, %v1242_v0  ;;  %v1076_v14 = vunpack.c.l.bf16 %v1165_v1 }
  0x28   : > { %779 = vst.msk [vmem:[%s1274_s25 + $0x38] sm:$0xf] %vm764_vm0, %v976_v30  ;;  %780 = vst.msk [vmem:[%s1274_s25 + $0x3c] sm:$0xf] %vm764_vm0, %v977_v31  ;;  %v328_v43 = vmul.f32 %v1065_v35, %v1242_v0  ;;  %v329_v44 = vmul.f32 %v1068_v36, %v1242_v0  ;;  %v330_v45 = vmul.f32 %v1069_v37, %v1242_v0  ;;  %v1077_v15 = vunpack.c.h.bf16 %v1165_v1 }
  0x29   : > { %v331_v46 = vmul.f32 %v1072_v38, %v1242_v0  ;;  %v332_v47 = vmul.f32 %v1073_v39, %v1242_v0  ;;  %v396_v48 = vadd.f32 %v1251_v9, %v325_v40  ;;  %v397_v49 = vadd.f32 %v1251_v9, %v326_v41 }
  0x2a   : > { %v398_v50 = vadd.f32 %v1251_v9, %v327_v42  ;;  %v399_v51 = vadd.f32 %v1251_v9, %v328_v43  ;;  %v400_v52 = vadd.f32 %v1251_v9, %v329_v44  ;;  %v401_v53 = vadd.f32 %v1251_v9, %v330_v45 }
  0x2b   : > { %v402_v54 = vadd.f32 %v1251_v9, %v331_v46  ;;  %v403_v55 = vadd.f32 %v1251_v9, %v332_v47  ;;  %v460_v56 = vmax.f32 %v396_v48, 0.0  ;;  %v461_v57 = vmax.f32 %v397_v49, 0.0  ;;  %v1169_v46 = vld [vmem:[%s1237_s18 + $0x80] sm:$0xff]   ;;  %v1170_v47 = vld [vmem:[%s1237_s18 + $0x88] sm:$0xff]  }
  0x2c   : > { %v462_v58 = vmax.f32 %v398_v50, 0.0  ;;  %v463_v59 = vmax.f32 %v399_v51, 0.0  ;;  %v464_v60 = vmax.f32 %v400_v52, 0.0  ;;  %v465_v61 = vmax.f32 %v401_v53, 0.0  ;;  %v1171_v52 = vld [vmem:[%s1237_s18 + $0x90] sm:$0xff]   ;;  %v1172_v53 = vld [vmem:[%s1237_s18 + $0x98] sm:$0xff]  }
  0x2d   : > { %v466_v62 = vmax.f32 %v402_v54, 0.0  ;;  %v467_v63 = vmax.f32 %v403_v55, 0.0  ;;  %v978_v3 = vpack.c.bf16 %v460_v56, %v460_v56  ;;  %v979_v4 = vpack.c.bf16 %v461_v57, %v461_v57 }
  0x2e   : > { %v980_v5 = vpack.c.bf16 %v462_v58, %v462_v58  ;;  %v981_v6 = vpack.c.bf16 %v463_v59, %v463_v59  ;;  %v982_v10 = vpack.c.bf16 %v464_v60, %v464_v60  ;;  %v983_v11 = vpack.c.bf16 %v465_v61, %v465_v61 }
  0x2f   : > { %v984_v12 = vpack.c.bf16 %v466_v62, %v466_v62  ;;  %v985_v13 = vpack.c.bf16 %v467_v63, %v467_v63  ;;  %781 = vst.msk [vmem:[%s1274_s25 + $0x40] sm:$0xf] %vm764_vm0, %v978_v3  ;;  %782 = vst.msk [vmem:[%s1274_s25 + $0x44] sm:$0xf] %vm764_vm0, %v979_v4  ;;  %v1080_v16 = vunpack.c.l.bf16 %v1166_v2  ;;  %v1081_v17 = vunpack.c.h.bf16 %v1166_v2 }
  0x30   : > { %783 = vst.msk [vmem:[%s1274_s25 + $0x48] sm:$0xf] %vm764_vm0, %v980_v5  ;;  %784 = vst.msk [vmem:[%s1274_s25 + $0x4c] sm:$0xf] %vm764_vm0, %v981_v6  ;;  %v1084_v18 = vunpack.c.l.bf16 %v1167_v7  ;;  %v1085_v19 = vunpack.c.h.bf16 %v1167_v7  ;;  %v1088_v20 = vunpack.c.l.bf16 %v1168_v8  ;;  %v1089_v21 = vunpack.c.h.bf16 %v1168_v8 }
  0x31   : > { %785 = vst.msk [vmem:[%s1274_s25 + $0x50] sm:$0xf] %vm764_vm0, %v982_v10  ;;  %786 = vst.msk [vmem:[%s1274_s25 + $0x54] sm:$0xf] %vm764_vm0, %v983_v11  ;;  %v333_v22 = vmul.f32 %v1076_v14, %v1242_v0  ;;  %v334_v23 = vmul.f32 %v1077_v15, %v1242_v0  ;;  %v335_v24 = vmul.f32 %v1080_v16, %v1242_v0  ;;  %v1092_v58 = vunpack.c.l.bf16 %v1169_v46 }
  0x32   : > { %787 = vst.msk [vmem:[%s1274_s25 + $0x58] sm:$0xf] %vm764_vm0, %v984_v12  ;;  %788 = vst.msk [vmem:[%s1274_s25 + $0x5c] sm:$0xf] %vm764_vm0, %v985_v13  ;;  %v336_v25 = vmul.f32 %v1081_v17, %v1242_v0  ;;  %v337_v26 = vmul.f32 %v1084_v18, %v1242_v0  ;;  %v338_v27 = vmul.f32 %v1085_v19, %v1242_v0  ;;  %v1093_v59 = vunpack.c.h.bf16 %v1169_v46 }
  0x33   : > { %v339_v28 = vmul.f32 %v1088_v20, %v1242_v0  ;;  %v340_v29 = vmul.f32 %v1089_v21, %v1242_v0  ;;  %v404_v30 = vadd.f32 %v1251_v9, %v333_v22  ;;  %v405_v31 = vadd.f32 %v1251_v9, %v334_v23 }
  0x34   : > { %v406_v32 = vadd.f32 %v1251_v9, %v335_v24  ;;  %v407_v33 = vadd.f32 %v1251_v9, %v336_v25  ;;  %v408_v34 = vadd.f32 %v1251_v9, %v337_v26  ;;  %v409_v35 = vadd.f32 %v1251_v9, %v338_v27 }
  0x35   : > { %v410_v36 = vadd.f32 %v1251_v9, %v339_v28  ;;  %v411_v37 = vadd.f32 %v1251_v9, %v340_v29  ;;  %v468_v38 = vmax.f32 %v404_v30, 0.0  ;;  %v469_v39 = vmax.f32 %v405_v31, 0.0  ;;  %v1173_v28 = vld [vmem:[%s1237_s18 + $0xa0] sm:$0xff]   ;;  %v1174_v29 = vld [vmem:[%s1237_s18 + $0xa8] sm:$0xff]  }
  0x36   : > { %v470_v40 = vmax.f32 %v406_v32, 0.0  ;;  %v471_v41 = vmax.f32 %v407_v33, 0.0  ;;  %v472_v42 = vmax.f32 %v408_v34, 0.0  ;;  %v473_v43 = vmax.f32 %v409_v35, 0.0  ;;  %v1175_v34 = vld [vmem:[%s1237_s18 + $0xb0] sm:$0xff]   ;;  %v1176_v35 = vld [vmem:[%s1237_s18 + $0xb8] sm:$0xff]  }
  0x37   : > { %v474_v44 = vmax.f32 %v410_v36, 0.0  ;;  %v475_v45 = vmax.f32 %v411_v37, 0.0  ;;  %v986_v48 = vpack.c.bf16 %v468_v38, %v468_v38  ;;  %v987_v49 = vpack.c.bf16 %v469_v39, %v469_v39 }
  0x38   : > { %v988_v50 = vpack.c.bf16 %v470_v40, %v470_v40  ;;  %v989_v51 = vpack.c.bf16 %v471_v41, %v471_v41  ;;  %v990_v54 = vpack.c.bf16 %v472_v42, %v472_v42  ;;  %v991_v55 = vpack.c.bf16 %v473_v43, %v473_v43 }
  0x39   : > { %v992_v56 = vpack.c.bf16 %v474_v44, %v474_v44  ;;  %v993_v57 = vpack.c.bf16 %v475_v45, %v475_v45  ;;  %789 = vst.msk [vmem:[%s1274_s25 + $0x60] sm:$0xf] %vm764_vm0, %v986_v48  ;;  %790 = vst.msk [vmem:[%s1274_s25 + $0x64] sm:$0xf] %vm764_vm0, %v987_v49  ;;  %v1096_v60 = vunpack.c.l.bf16 %v1170_v47  ;;  %v1097_v61 = vunpack.c.h.bf16 %v1170_v47 }
  0x3a   : > { %791 = vst.msk [vmem:[%s1274_s25 + $0x68] sm:$0xf] %vm764_vm0, %v988_v50  ;;  %792 = vst.msk [vmem:[%s1274_s25 + $0x6c] sm:$0xf] %vm764_vm0, %v989_v51  ;;  %v1100_v62 = vunpack.c.l.bf16 %v1171_v52  ;;  %v1101_v63 = vunpack.c.h.bf16 %v1171_v52  ;;  %v1104_v1 = vunpack.c.l.bf16 %v1172_v53  ;;  %v1105_v2 = vunpack.c.h.bf16 %v1172_v53 }
  0x3b   : > { %793 = vst.msk [vmem:[%s1274_s25 + $0x70] sm:$0xf] %vm764_vm0, %v990_v54  ;;  %794 = vst.msk [vmem:[%s1274_s25 + $0x74] sm:$0xf] %vm764_vm0, %v991_v55  ;;  %v341_v3 = vmul.f32 %v1092_v58, %v1242_v0  ;;  %v342_v4 = vmul.f32 %v1093_v59, %v1242_v0  ;;  %v343_v5 = vmul.f32 %v1096_v60, %v1242_v0  ;;  %v1108_v40 = vunpack.c.l.bf16 %v1173_v28 }
  0x3c   : > { %795 = vst.msk [vmem:[%s1274_s25 + $0x78] sm:$0xf] %vm764_vm0, %v992_v56  ;;  %796 = vst.msk [vmem:[%s1274_s25 + $0x7c] sm:$0xf] %vm764_vm0, %v993_v57  ;;  %v344_v6 = vmul.f32 %v1097_v61, %v1242_v0  ;;  %v345_v7 = vmul.f32 %v1100_v62, %v1242_v0  ;;  %v346_v8 = vmul.f32 %v1101_v63, %v1242_v0  ;;  %v1109_v41 = vunpack.c.h.bf16 %v1173_v28 }
  0x3d   : > { %v347_v10 = vmul.f32 %v1104_v1, %v1242_v0  ;;  %v348_v11 = vmul.f32 %v1105_v2, %v1242_v0  ;;  %v412_v12 = vadd.f32 %v1251_v9, %v341_v3  ;;  %v413_v13 = vadd.f32 %v1251_v9, %v342_v4 }
  0x3e   : > { %v414_v14 = vadd.f32 %v1251_v9, %v343_v5  ;;  %v415_v15 = vadd.f32 %v1251_v9, %v344_v6  ;;  %v416_v16 = vadd.f32 %v1251_v9, %v345_v7  ;;  %v417_v17 = vadd.f32 %v1251_v9, %v346_v8 }
  0x3f   : > { %v418_v18 = vadd.f32 %v1251_v9, %v347_v10  ;;  %v419_v19 = vadd.f32 %v1251_v9, %v348_v11  ;;  %v476_v20 = vmax.f32 %v412_v12, 0.0  ;;  %v477_v21 = vmax.f32 %v413_v13, 0.0  ;;  %v1177_v10 = vld [vmem:[%s1237_s18 + $0xc0] sm:$0xff]   ;;  %v1178_v11 = vld [vmem:[%s1237_s18 + $0xc8] sm:$0xff]  }
  0x40   : > { %v478_v22 = vmax.f32 %v414_v14, 0.0  ;;  %v479_v23 = vmax.f32 %v415_v15, 0.0  ;;  %v480_v24 = vmax.f32 %v416_v16, 0.0  ;;  %v481_v25 = vmax.f32 %v417_v17, 0.0  ;;  %v1179_v16 = vld [vmem:[%s1237_s18 + $0xd0] sm:$0xff]   ;;  %v1180_v17 = vld [vmem:[%s1237_s18 + $0xd8] sm:$0xff]  }
  0x41   : > { %v482_v26 = vmax.f32 %v418_v18, 0.0  ;;  %v483_v27 = vmax.f32 %v419_v19, 0.0  ;;  %v994_v30 = vpack.c.bf16 %v476_v20, %v476_v20  ;;  %v995_v31 = vpack.c.bf16 %v477_v21, %v477_v21 }
  0x42   : > { %v996_v32 = vpack.c.bf16 %v478_v22, %v478_v22  ;;  %v997_v33 = vpack.c.bf16 %v479_v23, %v479_v23  ;;  %v998_v36 = vpack.c.bf16 %v480_v24, %v480_v24  ;;  %v999_v37 = vpack.c.bf16 %v481_v25, %v481_v25 }
  0x43   : > { %v1000_v38 = vpack.c.bf16 %v482_v26, %v482_v26  ;;  %v1001_v39 = vpack.c.bf16 %v483_v27, %v483_v27  ;;  %797 = vst.msk [vmem:[%s1274_s25 + $0x80] sm:$0xf] %vm764_vm0, %v994_v30  ;;  %798 = vst.msk [vmem:[%s1274_s25 + $0x84] sm:$0xf] %vm764_vm0, %v995_v31  ;;  %v1112_v42 = vunpack.c.l.bf16 %v1174_v29  ;;  %v1113_v43 = vunpack.c.h.bf16 %v1174_v29 }
  0x44   : > { %799 = vst.msk [vmem:[%s1274_s25 + $0x88] sm:$0xf] %vm764_vm0, %v996_v32  ;;  %800 = vst.msk [vmem:[%s1274_s25 + $0x8c] sm:$0xf] %vm764_vm0, %v997_v33  ;;  %v1116_v44 = vunpack.c.l.bf16 %v1175_v34  ;;  %v1117_v45 = vunpack.c.h.bf16 %v1175_v34  ;;  %v1120_v46 = vunpack.c.l.bf16 %v1176_v35  ;;  %v1121_v47 = vunpack.c.h.bf16 %v1176_v35 }
  0x45   : > { %801 = vst.msk [vmem:[%s1274_s25 + $0x90] sm:$0xf] %vm764_vm0, %v998_v36  ;;  %802 = vst.msk [vmem:[%s1274_s25 + $0x94] sm:$0xf] %vm764_vm0, %v999_v37  ;;  %v349_v48 = vmul.f32 %v1108_v40, %v1242_v0  ;;  %v350_v49 = vmul.f32 %v1109_v41, %v1242_v0  ;;  %v351_v50 = vmul.f32 %v1112_v42, %v1242_v0  ;;  %v1124_v22 = vunpack.c.l.bf16 %v1177_v10 }
  0x46   : > { %803 = vst.msk [vmem:[%s1274_s25 + $0x98] sm:$0xf] %vm764_vm0, %v1000_v38  ;;  %804 = vst.msk [vmem:[%s1274_s25 + $0x9c] sm:$0xf] %vm764_vm0, %v1001_v39  ;;  %v352_v51 = vmul.f32 %v1113_v43, %v1242_v0  ;;  %v353_v52 = vmul.f32 %v1116_v44, %v1242_v0  ;;  %v354_v53 = vmul.f32 %v1117_v45, %v1242_v0  ;;  %v1125_v23 = vunpack.c.h.bf16 %v1177_v10 }
  0x47   : > { %v355_v54 = vmul.f32 %v1120_v46, %v1242_v0  ;;  %v356_v55 = vmul.f32 %v1121_v47, %v1242_v0  ;;  %v420_v56 = vadd.f32 %v1251_v9, %v349_v48  ;;  %v421_v57 = vadd.f32 %v1251_v9, %v350_v49 }
  0x48   : > { %v422_v58 = vadd.f32 %v1251_v9, %v351_v50  ;;  %v423_v59 = vadd.f32 %v1251_v9, %v352_v51  ;;  %v424_v60 = vadd.f32 %v1251_v9, %v353_v52  ;;  %v425_v61 = vadd.f32 %v1251_v9, %v354_v53 }
  0x49   : > { %v426_v62 = vadd.f32 %v1251_v9, %v355_v54  ;;  %v427_v63 = vadd.f32 %v1251_v9, %v356_v55  ;;  %v484_v1 = vmax.f32 %v420_v56, 0.0  ;;  %v485_v2 = vmax.f32 %v421_v57, 0.0  ;;  %v1181_v54 = vld [vmem:[%s1237_s18 + $0xe0] sm:$0xff]   ;;  %v1182_v55 = vld [vmem:[%s1237_s18 + $0xe8] sm:$0xff]  }
  0x4a   : > { %v486_v3 = vmax.f32 %v422_v58, 0.0  ;;  %v487_v4 = vmax.f32 %v423_v59, 0.0  ;;  %v488_v5 = vmax.f32 %v424_v60, 0.0  ;;  %v489_v6 = vmax.f32 %v425_v61, 0.0  ;;  %v1183_v60 = vld [vmem:[%s1237_s18 + $0xf0] sm:$0xff]   ;;  %v1184_v61 = vld [vmem:[%s1237_s18 + $0xf8] sm:$0xff]  }
  0x4b   : > { %v490_v7 = vmax.f32 %v426_v62, 0.0  ;;  %v491_v8 = vmax.f32 %v427_v63, 0.0  ;;  %v1002_v12 = vpack.c.bf16 %v484_v1, %v484_v1  ;;  %v1003_v13 = vpack.c.bf16 %v485_v2, %v485_v2 }
  0x4c   : > { %v1004_v14 = vpack.c.bf16 %v486_v3, %v486_v3  ;;  %v1005_v15 = vpack.c.bf16 %v487_v4, %v487_v4  ;;  %v1006_v18 = vpack.c.bf16 %v488_v5, %v488_v5  ;;  %v1007_v19 = vpack.c.bf16 %v489_v6, %v489_v6 }
  0x4d   : > { %v1008_v20 = vpack.c.bf16 %v490_v7, %v490_v7  ;;  %v1009_v21 = vpack.c.bf16 %v491_v8, %v491_v8  ;;  %805 = vst.msk [vmem:[%s1274_s25 + $0xa0] sm:$0xf] %vm764_vm0, %v1002_v12  ;;  %806 = vst.msk [vmem:[%s1274_s25 + $0xa4] sm:$0xf] %vm764_vm0, %v1003_v13  ;;  %v1128_v24 = vunpack.c.l.bf16 %v1178_v11  ;;  %v1129_v25 = vunpack.c.h.bf16 %v1178_v11 }
  0x4e   : > { %807 = vst.msk [vmem:[%s1274_s25 + $0xa8] sm:$0xf] %vm764_vm0, %v1004_v14  ;;  %808 = vst.msk [vmem:[%s1274_s25 + $0xac] sm:$0xf] %vm764_vm0, %v1005_v15  ;;  %v1132_v26 = vunpack.c.l.bf16 %v1179_v16  ;;  %v1133_v27 = vunpack.c.h.bf16 %v1179_v16  ;;  %v1136_v28 = vunpack.c.l.bf16 %v1180_v17  ;;  %v1137_v29 = vunpack.c.h.bf16 %v1180_v17 }
  0x4f   : > { %809 = vst.msk [vmem:[%s1274_s25 + $0xb0] sm:$0xf] %vm764_vm0, %v1006_v18  ;;  %810 = vst.msk [vmem:[%s1274_s25 + $0xb4] sm:$0xf] %vm764_vm0, %v1007_v19  ;;  %v357_v30 = vmul.f32 %v1124_v22, %v1242_v0  ;;  %v358_v31 = vmul.f32 %v1125_v23, %v1242_v0  ;;  %v359_v32 = vmul.f32 %v1128_v24, %v1242_v0  ;;  %v1140_v3 = vunpack.c.l.bf16 %v1181_v54 }
  0x50   : > { %811 = vst.msk [vmem:[%s1274_s25 + $0xb8] sm:$0xf] %vm764_vm0, %v1008_v20  ;;  %812 = vst.msk [vmem:[%s1274_s25 + $0xbc] sm:$0xf] %vm764_vm0, %v1009_v21  ;;  %v360_v33 = vmul.f32 %v1129_v25, %v1242_v0  ;;  %v361_v34 = vmul.f32 %v1132_v26, %v1242_v0  ;;  %v362_v35 = vmul.f32 %v1133_v27, %v1242_v0  ;;  %v1141_v4 = vunpack.c.h.bf16 %v1181_v54 }
  0x51   : > { %v363_v36 = vmul.f32 %v1136_v28, %v1242_v0  ;;  %v364_v37 = vmul.f32 %v1137_v29, %v1242_v0  ;;  %v428_v38 = vadd.f32 %v1251_v9, %v357_v30  ;;  %v429_v39 = vadd.f32 %v1251_v9, %v358_v31 }
  0x52   : > { %v430_v40 = vadd.f32 %v1251_v9, %v359_v32  ;;  %v431_v41 = vadd.f32 %v1251_v9, %v360_v33  ;;  %v432_v42 = vadd.f32 %v1251_v9, %v361_v34  ;;  %v433_v43 = vadd.f32 %v1251_v9, %v362_v35 }
  0x53   : > { %v434_v44 = vadd.f32 %v1251_v9, %v363_v36  ;;  %v435_v45 = vadd.f32 %v1251_v9, %v364_v37  ;;  %v492_v46 = vmax.f32 %v428_v38, 0.0  ;;  %v493_v47 = vmax.f32 %v429_v39, 0.0 }
  0x54   : > { %v494_v48 = vmax.f32 %v430_v40, 0.0  ;;  %v495_v49 = vmax.f32 %v431_v41, 0.0  ;;  %v496_v50 = vmax.f32 %v432_v42, 0.0  ;;  %v497_v51 = vmax.f32 %v433_v43, 0.0 }
  0x55   : > { %v498_v52 = vmax.f32 %v434_v44, 0.0  ;;  %v499_v53 = vmax.f32 %v435_v45, 0.0  ;;  %v1010_v56 = vpack.c.bf16 %v492_v46, %v492_v46  ;;  %v1011_v57 = vpack.c.bf16 %v493_v47, %v493_v47 }
  0x56   : > { %v1012_v58 = vpack.c.bf16 %v494_v48, %v494_v48  ;;  %v1013_v59 = vpack.c.bf16 %v495_v49, %v495_v49  ;;  %v1014_v62 = vpack.c.bf16 %v496_v50, %v496_v50  ;;  %v1015_v63 = vpack.c.bf16 %v497_v51, %v497_v51 }
  0x57   : > { %v1016_v1 = vpack.c.bf16 %v498_v52, %v498_v52  ;;  %v1017_v2 = vpack.c.bf16 %v499_v53, %v499_v53  ;;  %813 = vst.msk [vmem:[%s1274_s25 + $0xc0] sm:$0xf] %vm764_vm0, %v1010_v56  ;;  %814 = vst.msk [vmem:[%s1274_s25 + $0xc4] sm:$0xf] %vm764_vm0, %v1011_v57  ;;  %v1144_v5 = vunpack.c.l.bf16 %v1182_v55  ;;  %v1145_v6 = vunpack.c.h.bf16 %v1182_v55 }
  0x58   : > { %815 = vst.msk [vmem:[%s1274_s25 + $0xc8] sm:$0xf] %vm764_vm0, %v1012_v58  ;;  %816 = vst.msk [vmem:[%s1274_s25 + $0xcc] sm:$0xf] %vm764_vm0, %v1013_v59  ;;  %v1148_v7 = vunpack.c.l.bf16 %v1183_v60  ;;  %v1149_v8 = vunpack.c.h.bf16 %v1183_v60  ;;  %v1152_v10 = vunpack.c.l.bf16 %v1184_v61  ;;  %v1153_v11 = vunpack.c.h.bf16 %v1184_v61 }
  0x59   : > { %817 = vst.msk [vmem:[%s1274_s25 + $0xd0] sm:$0xf] %vm764_vm0, %v1014_v62  ;;  %818 = vst.msk [vmem:[%s1274_s25 + $0xd4] sm:$0xf] %vm764_vm0, %v1015_v63  ;;  %v365_v12 = vmul.f32 %v1140_v3, %v1242_v0  ;;  %v366_v13 = vmul.f32 %v1141_v4, %v1242_v0  ;;  %v367_v14 = vmul.f32 %v1144_v5, %v1242_v0 }
  0x5a   : > { %819 = vst.msk [vmem:[%s1274_s25 + $0xd8] sm:$0xf] %vm764_vm0, %v1016_v1  ;;  %820 = vst.msk [vmem:[%s1274_s25 + $0xdc] sm:$0xf] %vm764_vm0, %v1017_v2  ;;  %v368_v15 = vmul.f32 %v1145_v6, %v1242_v0  ;;  %v369_v16 = vmul.f32 %v1148_v7, %v1242_v0  ;;  %v370_v17 = vmul.f32 %v1149_v8, %v1242_v0 }
  0x5b   : > { %v371_v18 = vmul.f32 %v1152_v10, %v1242_v0  ;;  %v372_v19 = vmul.f32 %v1153_v11, %v1242_v0  ;;  %v436_v20 = vadd.f32 %v1251_v9, %v365_v12  ;;  %v437_v21 = vadd.f32 %v1251_v9, %v366_v13 }
  0x5c   : > { %v438_v22 = vadd.f32 %v1251_v9, %v367_v14  ;;  %v439_v23 = vadd.f32 %v1251_v9, %v368_v15  ;;  %v440_v24 = vadd.f32 %v1251_v9, %v369_v16  ;;  %v441_v25 = vadd.f32 %v1251_v9, %v370_v17 }
  0x5d   : > { %v442_v26 = vadd.f32 %v1251_v9, %v371_v18  ;;  %v443_v27 = vadd.f32 %v1251_v9, %v372_v19  ;;  %v500_v28 = vmax.f32 %v436_v20, 0.0  ;;  %v501_v29 = vmax.f32 %v437_v21, 0.0 }
  0x5e   : > { %v502_v0 = vmax.f32 %v438_v22, 0.0  ;;  %v503_v30 = vmax.f32 %v439_v23, 0.0  ;;  %v504_v31 = vmax.f32 %v440_v24, 0.0  ;;  %v505_v32 = vmax.f32 %v441_v25, 0.0 }
  0x5f   : > { %v506_v33 = vmax.f32 %v442_v26, 0.0  ;;  %v507_v34 = vmax.f32 %v443_v27, 0.0  ;;  %v1018_v35 = vpack.c.bf16 %v500_v28, %v500_v28  ;;  %v1019_v36 = vpack.c.bf16 %v501_v29, %v501_v29 }
  0x60   : > { %v1020_v37 = vpack.c.bf16 %v502_v0, %v502_v0  ;;  %v1021_v9 = vpack.c.bf16 %v503_v30, %v503_v30  ;;  %v1022_v38 = vpack.c.bf16 %v504_v31, %v504_v31  ;;  %v1023_v39 = vpack.c.bf16 %v505_v32, %v505_v32 }
  0x61   : > { %v1024_v40 = vpack.c.bf16 %v506_v33, %v506_v33  ;;  %v1025_v41 = vpack.c.bf16 %v507_v34, %v507_v34  ;;  %821 = vst.msk [vmem:[%s1274_s25 + $0xe0] sm:$0xf] %vm764_vm0, %v1018_v35  ;;  %822 = vst.msk [vmem:[%s1274_s25 + $0xe4] sm:$0xf] %vm764_vm0, %v1019_v36 }
  0x62   : > { %823 = vst.msk [vmem:[%s1274_s25 + $0xe8] sm:$0xf] %vm764_vm0, %v1020_v37  ;;  %824 = vst.msk [vmem:[%s1274_s25 + $0xec] sm:$0xf] %vm764_vm0, %v1021_v9 }
  0x63   : > { %825 = vst.msk [vmem:[%s1274_s25 + $0xf0] sm:$0xf] %vm764_vm0, %v1022_v38  ;;  %826 = vst.msk [vmem:[%s1274_s25 + $0xf4] sm:$0xf] %vm764_vm0, %v1023_v39 }
  0x64   : > { %827 = vst.msk [vmem:[%s1274_s25 + $0xf8] sm:$0xf] %vm764_vm0, %v1024_v40  ;;  %828 = vst.msk [vmem:[%s1274_s25 + $0xfc] sm:$0xf] %vm764_vm0, %v1025_v41 }
  0x65 PF: > { %s13_s12 = sadd.s32 1, %s1199_s12  }
  0x66   : > { %p10_p4 = scmp.ge.s32.totalorder %s13_s12, 4  }
  0x68   :  { %12 = sbr.rel (!%p10_p4) target bundleno = 1 (0x1), region = 62 }

// kernel: spatio_temporal_conv_forward.7
= control target key start
LH: loop header
LB: loop body
LE: loop exit
PB: predicated region body
PF: predicated region fallthrough
CT: control target
= control target key end

     0   :  { %7 = vsyncpa [#allocation3], 0  ;;  %s1581_s0 = inlined_call_operand.vmem [shape: bf16[1024,128], index: 0, kind: input, shape index: {}]   ;;  %s1582_s1 = inlined_call_operand.vmem [shape: bf16[128,128], index: 1, kind: input, shape index: {}]   ;;  %s1583_s2 = inlined_call_operand.hbm [shape: f32[1024,128], index: 2, kind: output, shape index: {}]  }
   0x1   :  { %9 = vsyncpa [#allocation3 + $0x1], 0  ;;  %s1338_s9 = smov 0   ;;  %s1340_s10 = smov 0  }
   0x2   :  { %s1342_s11 = smov 0   ;;  %s1344_s12 = smov 0  }
   0x3   :  { %s1346_s13 = smov 0   ;;  %s1348_s14 = smov 0  }
   0x4 LB: > { %s952_s15 = sadd.s32 4294967295, %s1318_s14   ;;  %s953_s16 = sadd.s32 4294967294, %s1318_s14   ;;  %s1318_s14 = sphi %s1348_s14, %s15_s14   ;;  %s1314_s13 = sphi %s1346_s13, %s1590_s13   ;;  %s1310_s12 = sphi %s1344_s12, %s1589_s12   ;;  %s1306_s11 = sphi %s1342_s11, %s1588_s11   ;;  %s1302_s10 = sphi %s1340_s10, %s1587_s10   ;;  %s1298_s9 = sphi %s1338_s9, %s1586_s9  }
   0x5   : > { %s27_s17 = sadd.s32 1, %s1314_s13  ;;  %s88_s18 = sadd.s32 1, %s1306_s11 }
   0x6   : > { %p29_p0 = scmp.ge.s32.totalorder %s27_s17, 2  ;;  %p98_p1 = scmp.ne.s32.totalorder %s1306_s11, %s1302_s10 }
   0x7   : > { %p99_p2 = scmp.eq.s32.totalorder %s952_s15, 1  ;;  %p104_p3 = scmp.ne.s32.totalorder %s1302_s10, %s1298_s9 }
   0x8   : > { %s1592_s17 = smov (%p29_p0, %s27_s17), 0  ;;  %p105_p5 = scmp.eq.s32.totalorder %s953_s16, 1 }
   0x9   : > { %p1378_p4 = por %p99_p2, %p98_p1  ;;  %s83_s20 = ssub.s32 %s1314_s13, %s1592_s17 }
   0xa   : > { %p957_p6 = scmp.ge.s32.totalorder %s1318_s14, 1  ;;  %p86_p7 = scmp.eq.s32.totalorder %s83_s20, 0 }
   0xb   : > { %p1385_p8 = por %p105_p5, %p104_p3  ;;  %p139_p9 = scmp.lt.s32.totalorder %s1318_s14, 3 }
   0xc   : > { %s1391_s22 = scalar_select %p86_p7, %s1306_s11, %s88_s18  }
   0xd   : > { %p140_p10 = pnand %p957_p6, %p139_p9 }
   0xe   : > { %v1200_v0 = vld [vmem:[%s1582_s1] sm:$0xff] (!%p140_p10)   ;;  %s959_s25 = sshll.u32 (!%p140_p10), %s1310_s12, 6  ;;  %v1201_v1 = vld [vmem:[%s1582_s1 + $0x8] sm:$0xff] (!%p140_p10)   ;;  %v1202_v2 = vld [vmem:[%s1582_s1 + $0x10] sm:$0xff] (!%p140_p10)   ;;  %s162_s26 = sand.u32 (!%p140_p10), 1, %s1302_s10  }
   0xf   : > { %143 = sbr.rel (%p140_p10) target bundleno = 333 (0x14d), region = 28  ;;  %p166_p11 = scmp.lt.s32.totalorder (!%p140_p10), %s959_s25, 127  ;;  %1047 = vmatprep.subr.bf16.mxu0 (!%p140_p10), %v1200_v0  ;;  %1127 = vmatprep.subr.bf16.mxu1 (!%p140_p10), %v1200_v0  ;;  %v1203_v3 = vld [vmem:[%s1582_s1 + $0x18] sm:$0xff] (!%p140_p10)   ;;  %v1204_v6 = vld [vmem:[%s1582_s1 + $0x20] sm:$0xff] (!%p140_p10)   ;;  %v1205_v7 = vld [vmem:[%s1582_s1 + $0x28] sm:$0xff] (!%p140_p10)  }
  0x10   : > { %1048 = vmatpush3.bf16.msra.mxu0 (!%p140_p10), %v1200_v0  ;;  %1135 = vmatpush3.bf16.msra.mxu1 (!%p140_p10), %v1200_v0  ;;  %v1206_v8 = vld [vmem:[%s1582_s1 + $0x30] sm:$0xff] (!%p140_p10)   ;;  %v1207_v9 = vld [vmem:[%s1582_s1 + $0x38] sm:$0xff] (!%p140_p10)   ;;  %s958_s27 = sshll.u32 (!%p140_p10), %s162_s26, 9  ;;  %s1006_s29 = sshll.u32 (!%p140_p10), %s1310_s12, 13 }
  0x11   : > { %1049 = vmatprep.subr.bf16.mxu0 (!%p140_p10), %v1201_v1  ;;  %1128 = vmatprep.subr.bf16.mxu1 (!%p140_p10), %v1201_v1  ;;  %s1458_s28 = scalar_lea.vmem (!%p140_p10), [#allocation2], %s958_s27  ;;  %s1535_s12 = scalar_lea.sflag (!%p140_p10), [#allocation3], %s162_s26 }
  0x12   : > { %s1320_s7 = smov (!%p140_p10), [#allocation2]  }
  0x13   : > { %s1244_s8 = sshll.u32 (!%p140_p10), %s1320_s7, 4  ;;  %s1245_s8 = int_to_ptr.vmem [resolvable:$false] %s1244_s8 }
  0x14   : > { %1050 = vmatpush3.bf16.msra.mxu0 (!%p140_p10), %v1201_v1  ;;  %1136 = vmatpush3.bf16.msra.mxu1 (!%p140_p10), %v1201_v1  ;;  %s1246_s15 = scalar_lea.vmem (!%p140_p10), %s1245_s8, 16384 }
  0x15   : > { %1051 = vmatprep.subr.bf16.mxu0 (!%p140_p10), %v1202_v2  ;;  %1129 = vmatprep.subr.bf16.mxu1 (!%p140_p10), %v1202_v2 }
  0x16   : > { %s1594_s25 = smov (!%p166_p11, %s959_s25), 127 }
  0x17   : > { %s960_s30 = sshll.u32 %s1594_s25, 2 }
  0x18   : > { %s1406_s5 = scalar_lea.vmem %s1581_s0, %s960_s30  ;;  %1052 = vmatpush3.bf16.msra.mxu0 %v1202_v2  ;;  %1137 = vmatpush3.bf16.msra.mxu1 %v1202_v2  ;;  %s865_s30 = sshll.u32 %s1458_s28, 4  ;;  %s1525_s30 = int_to_ptr.vmem [resolvable:$true] %s865_s30 }
  0x19   : > { %v1208_v4 = vld [vmem:[%s1406_s5] sm:$0xff]   ;;  %1053 = vmatprep.subr.bf16.mxu0 %v1203_v3  ;;  %1130 = vmatprep.subr.bf16.mxu1 %v1203_v3  ;;  %v1210_v10 = vld [vmem:[%s1406_s5 + $0x8] sm:$0xff]   ;;  %v1212_v12 = vld [vmem:[%s1406_s5 + $0x10] sm:$0xff]   ;;  %s1240_s6 = scalar_lea.vmem %s1525_s30, 8192  ;;  %p1247_p1 = scmp.lt.s32.totalorder %s1525_s30, %s1245_s8 }
  0x1a   : > { %v1209_v5 = vld [vmem:[%s1406_s5 + $0x80] sm:$0xff]   ;;  %1063 = vmatprep.mubr.bf16.mxu0 %v1208_v4  ;;  %v1211_v11 = vld [vmem:[%s1406_s5 + $0x88] sm:$0xff]   ;;  %v1213_v13 = vld [vmem:[%s1406_s5 + $0x90] sm:$0xff]   ;;  %p1241_p12 = scmp.ne.s32.totalorder %s1525_s30, %s1240_s6  ;;  %p1248_p2 = scmp.lt.s32.totalorder %s1246_s15, %s1240_s6 }
  0x1b   : > { %1095 = vmatprep.mubr.bf16.mxu1 %v1209_v5  ;;  %v1214_v14 = vld [vmem:[%s1406_s5 + $0x18] sm:$0xff]   ;;  %v1216_v16 = vld [vmem:[%s1406_s5 + $0x20] sm:$0xff]   ;;  %v1218_v18 = vld [vmem:[%s1406_s5 + $0x28] sm:$0xff]  }
  0x1c   : > { %1054 = vmatpush3.bf16.msra.mxu0 %v1203_v3  ;;  %1138 = vmatpush3.bf16.msra.mxu1 %v1203_v3  ;;  %v1215_v15 = vld [vmem:[%s1406_s5 + $0x98] sm:$0xff]   ;;  %v1217_v17 = vld [vmem:[%s1406_s5 + $0xa0] sm:$0xff]   ;;  %v1219_v19 = vld [vmem:[%s1406_s5 + $0xa8] sm:$0xff]   ;;  %p1242_p13 = pnand %p1241_p12, %p1378_p4  ;;  %p1249_p3 = por %p1248_p2, %p1247_p1 }
  0x1d   : > { %1055 = vmatprep.subr.bf16.mxu0 %v1204_v6  ;;  %1131 = vmatprep.subr.bf16.mxu1 %v1204_v6  ;;  %v1220_v20 = vld [vmem:[%s1406_s5 + $0x30] sm:$0xff]   ;;  %v1222_v22 = vld [vmem:[%s1406_s5 + $0x38] sm:$0xff]   ;;  %v1224_v24 = vld [vmem:[%s1406_s5 + $0x40] sm:$0xff]  }
  0x1e   : > { %v1221_v21 = vld [vmem:[%s1406_s5 + $0xb0] sm:$0xff]   ;;  %v1223_v23 = vld [vmem:[%s1406_s5 + $0xb8] sm:$0xff]   ;;  %v1225_v25 = vld [vmem:[%s1406_s5 + $0xc0] sm:$0xff]   ;;  %p1243_p0 = pneg %p1242_p13 }
  0x1f   : > { %v1226_v26 = vld [vmem:[%s1406_s5 + $0x48] sm:$0xff]   ;;  %v1228_v28 = vld [vmem:[%s1406_s5 + $0x50] sm:$0xff]   ;;  %v1230_v30 = vld [vmem:[%s1406_s5 + $0x58] sm:$0xff]  }
  0x20   : > { %1056 = vmatpush3.bf16.msra.mxu0 %v1204_v6  ;;  %1139 = vmatpush3.bf16.msra.mxu1 %v1204_v6  ;;  %v1227_v27 = vld [vmem:[%s1406_s5 + $0xc8] sm:$0xff]   ;;  %v1229_v29 = vld [vmem:[%s1406_s5 + $0xd0] sm:$0xff]   ;;  %v1231_v31 = vld [vmem:[%s1406_s5 + $0xd8] sm:$0xff]   ;;  %p1250_p5 = pnand %p1249_p3, %p1243_p0 }
  0x21   : > { %1057 = vmatprep.subr.bf16.mxu0 %v1205_v7  ;;  %1132 = vmatprep.subr.bf16.mxu1 %v1205_v7  ;;  %v1232_v32 = vld [vmem:[%s1406_s5 + $0x60] sm:$0xff]   ;;  %v1234_v34 = vld [vmem:[%s1406_s5 + $0x68] sm:$0xff]   ;;  %v1236_v36 = vld [vmem:[%s1406_s5 + $0x70] sm:$0xff]  }
  0x22   : > { %v1233_v33 = vld [vmem:[%s1406_s5 + $0xe0] sm:$0xff]   ;;  %v1235_v35 = vld [vmem:[%s1406_s5 + $0xe8] sm:$0xff]   ;;  %v1237_v37 = vld [vmem:[%s1406_s5 + $0xf0] sm:$0xff]  }
  0x23   : > { %v1238_v38 = vld [vmem:[%s1406_s5 + $0x78] sm:$0xff]  }
  0x24   : > { %1058 = vmatpush3.bf16.msra.mxu0 %v1205_v7  ;;  %1140 = vmatpush3.bf16.msra.mxu1 %v1205_v7  ;;  %v1239_v39 = vld [vmem:[%s1406_s5 + $0xf8] sm:$0xff]   ;;  %s1523_s5 = scalar_lea.hbm %s1583_s2, %s1006_s29 }
  0x25   : > { %1059 = vmatprep.subr.bf16.mxu0 %v1206_v8  ;;  %1133 = vmatprep.subr.bf16.mxu1 %v1206_v8 }
  0x28   : > { %1060 = vmatpush3.bf16.msra.mxu0 %v1206_v8  ;;  %1141 = vmatpush3.bf16.msra.mxu1 %v1206_v8 }
  0x29   : > { %1061 = vmatprep.subr.bf16.mxu0 %v1207_v9  ;;  %1134 = vmatprep.subr.bf16.mxu1 %v1207_v9 }
  0x2c   : > { %1062 = vmatpush3.bf16.msra.mxu0 %v1207_v9  ;;  %1142 = vmatpush3.bf16.msra.mxu1 %v1207_v9 }
  0x2f   : > { %1064 = vmatmul.mubr.bf16.vlgmr.msra.gmra.mrb[0].mxu0 %v1210_v10  ;;  %1096 = vmatmul.mubr.bf16.vlgmr.msra.gmra.mrb[0].mxu1 %v1211_v11 }
  0x30   : > { %1067 = vmatprep.mubr.bf16.mxu0 %v1212_v12  ;;  %1099 = vmatprep.mubr.bf16.mxu1 %v1213_v13 }
  0x37   : > { %1068 = vmatmul.mubr.bf16.gmra.mrb[4].mxu0 %v1214_v14  ;;  %1100 = vmatmul.mubr.bf16.gmra.mrb[4].mxu1 %v1215_v15 }
  0x38   : > { %1071 = vmatprep.mubr.bf16.mxu0 %v1216_v16  ;;  %1103 = vmatprep.mubr.bf16.mxu1 %v1217_v17 }
  0x3f   : > { %1072 = vmatmul.mubr.bf16.gmra.mrb[8].mxu0 %v1218_v18  ;;  %1104 = vmatmul.mubr.bf16.gmra.mrb[8].mxu1 %v1219_v19 }
  0x40   : > { %1075 = vmatprep.mubr.bf16.mxu0 %v1220_v20  ;;  %1107 = vmatprep.mubr.bf16.mxu1 %v1221_v21 }
  0x47   : > { %1076 = vmatmul.mubr.bf16.gmra.mrb[12].mxu0 %v1222_v22  ;;  %1108 = vmatmul.mubr.bf16.gmra.mrb[12].mxu1 %v1223_v23 }
  0x48   : > { %1079 = vmatprep.mubr.bf16.mxu0 %v1224_v24  ;;  %1111 = vmatprep.mubr.bf16.mxu1 %v1225_v25 }
  0x4f   : > { %1080 = vmatmul.mubr.bf16.gmra.mrb[16].mxu0 %v1226_v26  ;;  %1112 = vmatmul.mubr.bf16.gmra.mrb[16].mxu1 %v1227_v27 }
  0x50   : > { %1083 = vmatprep.mubr.bf16.mxu0 %v1228_v28  ;;  %1115 = vmatprep.mubr.bf16.mxu1 %v1229_v29 }
  0x57   : > { %1084 = vmatmul.mubr.bf16.gmra.mrb[20].mxu0 %v1230_v30  ;;  %1116 = vmatmul.mubr.bf16.gmra.mrb[20].mxu1 %v1231_v31 }
  0x58   : > { %1087 = vmatprep.mubr.bf16.mxu0 %v1232_v32  ;;  %1119 = vmatprep.mubr.bf16.mxu1 %v1233_v33 }
  0x5f   : > { %1088 = vmatmul.mubr.bf16.gmra.mrb[24].mxu0 %v1234_v34  ;;  %1120 = vmatmul.mubr.bf16.gmra.mrb[24].mxu1 %v1235_v35 }
  0x60   : > { %1091 = vmatprep.mubr.bf16.mxu0 %v1236_v36  ;;  %1123 = vmatprep.mubr.bf16.mxu1 %v1237_v37 }
  0x67   : > { %1092 = vmatmul.mubr.bf16.gmra.mrb[28].mxu0 %v1238_v38  ;;  %1124 = vmatmul.mubr.bf16.gmra.mrb[28].mxu1 %v1239_v39 }
 0x102   : > { %v1065_v40 = vpop.f32.mrb[0].mxu0  ;;  %v1097_v41 = vpop.f32.mrb[0].mxu1 }
 0x103   : > { %788 = vst [vmem:[%s1458_s28 + $0x10] sm:$0xff] %v1065_v40  ;;  %820 = vst [vmem:[%s1458_s28 + $0x110] sm:$0xff] %v1097_v41  ;;  %v531_v42 = vpop.f32.mrb[1].mxu0  ;;  %v659_v43 = vpop.f32.mrb[1].mxu1 }
 0x104   : > { %786 = vst [vmem:[%s1458_s28] sm:$0xff] %v531_v42  ;;  %818 = vst [vmem:[%s1458_s28 + $0x100] sm:$0xff] %v659_v43  ;;  %v1066_v44 = vpop.f32.mrb[2].mxu0  ;;  %v1098_v45 = vpop.f32.mrb[2].mxu1 }
 0x105   : > { %789 = vst [vmem:[%s1458_s28 + $0x18] sm:$0xff] %v1066_v44  ;;  %821 = vst [vmem:[%s1458_s28 + $0x118] sm:$0xff] %v1098_v45  ;;  %v534_v46 = vpop.f32.mrb[3].mxu0  ;;  %v662_v47 = vpop.f32.mrb[3].mxu1 }
 0x106   : > { %787 = vst [vmem:[%s1458_s28 + $0x8] sm:$0xff] %v534_v46  ;;  %819 = vst [vmem:[%s1458_s28 + $0x108] sm:$0xff] %v662_v47 }
 0x10a   : > { %v1069_v48 = vpop.f32.mrb[4].mxu0  ;;  %v1101_v49 = vpop.f32.mrb[4].mxu1 }
 0x10b   : > { %792 = vst [vmem:[%s1458_s28 + $0x30] sm:$0xff] %v1069_v48  ;;  %824 = vst [vmem:[%s1458_s28 + $0x130] sm:$0xff] %v1101_v49  ;;  %v547_v50 = vpop.f32.mrb[5].mxu0  ;;  %v675_v51 = vpop.f32.mrb[5].mxu1 }
 0x10c   : > { %790 = vst [vmem:[%s1458_s28 + $0x20] sm:$0xff] %v547_v50  ;;  %822 = vst [vmem:[%s1458_s28 + $0x120] sm:$0xff] %v675_v51  ;;  %v1070_v52 = vpop.f32.mrb[6].mxu0  ;;  %v1102_v53 = vpop.f32.mrb[6].mxu1 }
 0x10d   : > { %793 = vst [vmem:[%s1458_s28 + $0x38] sm:$0xff] %v1070_v52  ;;  %825 = vst [vmem:[%s1458_s28 + $0x138] sm:$0xff] %v1102_v53  ;;  %v550_v54 = vpop.f32.mrb[7].mxu0  ;;  %v678_v55 = vpop.f32.mrb[7].mxu1 }
 0x10e   : > { %791 = vst [vmem:[%s1458_s28 + $0x28] sm:$0xff] %v550_v54  ;;  %823 = vst [vmem:[%s1458_s28 + $0x128] sm:$0xff] %v678_v55 }
 0x112   : > { %v1073_v56 = vpop.f32.mrb[8].mxu0  ;;  %v1105_v57 = vpop.f32.mrb[8].mxu1 }
 0x113   : > { %796 = vst [vmem:[%s1458_s28 + $0x50] sm:$0xff] %v1073_v56  ;;  %828 = vst [vmem:[%s1458_s28 + $0x150] sm:$0xff] %v1105_v57  ;;  %v563_v58 = vpop.f32.mrb[9].mxu0  ;;  %v691_v59 = vpop.f32.mrb[9].mxu1 }
 0x114   : > { %794 = vst [vmem:[%s1458_s28 + $0x40] sm:$0xff] %v563_v58  ;;  %826 = vst [vmem:[%s1458_s28 + $0x140] sm:$0xff] %v691_v59  ;;  %v1074_v60 = vpop.f32.mrb[10].mxu0  ;;  %v1106_v61 = vpop.f32.mrb[10].mxu1 }
 0x115   : > { %797 = vst [vmem:[%s1458_s28 + $0x58] sm:$0xff] %v1074_v60  ;;  %829 = vst [vmem:[%s1458_s28 + $0x158] sm:$0xff] %v1106_v61  ;;  %v566_v62 = vpop.f32.mrb[11].mxu0  ;;  %v694_v63 = vpop.f32.mrb[11].mxu1 }
 0x116   : > { %795 = vst [vmem:[%s1458_s28 + $0x48] sm:$0xff] %v566_v62  ;;  %827 = vst [vmem:[%s1458_s28 + $0x148] sm:$0xff] %v694_v63 }
 0x11a   : > { %v1077_v0 = vpop.f32.mrb[12].mxu0  ;;  %v1109_v1 = vpop.f32.mrb[12].mxu1 }
 0x11b   : > { %800 = vst [vmem:[%s1458_s28 + $0x70] sm:$0xff] %v1077_v0  ;;  %832 = vst [vmem:[%s1458_s28 + $0x170] sm:$0xff] %v1109_v1  ;;  %v579_v2 = vpop.f32.mrb[13].mxu0  ;;  %v707_v3 = vpop.f32.mrb[13].mxu1 }
 0x11c   : > { %798 = vst [vmem:[%s1458_s28 + $0x60] sm:$0xff] %v579_v2  ;;  %830 = vst [vmem:[%s1458_s28 + $0x160] sm:$0xff] %v707_v3  ;;  %v1078_v4 = vpop.f32.mrb[14].mxu0  ;;  %v1110_v5 = vpop.f32.mrb[14].mxu1 }
 0x11d   : > { %801 = vst [vmem:[%s1458_s28 + $0x78] sm:$0xff] %v1078_v4  ;;  %833 = vst [vmem:[%s1458_s28 + $0x178] sm:$0xff] %v1110_v5  ;;  %v582_v6 = vpop.f32.mrb[15].mxu0  ;;  %v710_v7 = vpop.f32.mrb[15].mxu1 }
 0x11e   : > { %799 = vst [vmem:[%s1458_s28 + $0x68] sm:$0xff] %v582_v6  ;;  %831 = vst [vmem:[%s1458_s28 + $0x168] sm:$0xff] %v710_v7 }
 0x122   : > { %v1081_v8 = vpop.f32.mrb[16].mxu0  ;;  %v1113_v9 = vpop.f32.mrb[16].mxu1 }
 0x123   : > { %804 = vst [vmem:[%s1458_s28 + $0x90] sm:$0xff] %v1081_v8  ;;  %836 = vst [vmem:[%s1458_s28 + $0x190] sm:$0xff] %v1113_v9  ;;  %v595_v10 = vpop.f32.mrb[17].mxu0  ;;  %v723_v11 = vpop.f32.mrb[17].mxu1 }
 0x124   : > { %802 = vst [vmem:[%s1458_s28 + $0x80] sm:$0xff] %v595_v10  ;;  %834 = vst [vmem:[%s1458_s28 + $0x180] sm:$0xff] %v723_v11  ;;  %v1082_v12 = vpop.f32.mrb[18].mxu0  ;;  %v1114_v13 = vpop.f32.mrb[18].mxu1 }
 0x125   : > { %805 = vst [vmem:[%s1458_s28 + $0x98] sm:$0xff] %v1082_v12  ;;  %837 = vst [vmem:[%s1458_s28 + $0x198] sm:$0xff] %v1114_v13  ;;  %v598_v14 = vpop.f32.mrb[19].mxu0  ;;  %v726_v15 = vpop.f32.mrb[19].mxu1 }
 0x126   : > { %803 = vst [vmem:[%s1458_s28 + $0x88] sm:$0xff] %v598_v14  ;;  %835 = vst [vmem:[%s1458_s28 + $0x188] sm:$0xff] %v726_v15 }
 0x12a   : > { %v1085_v16 = vpop.f32.mrb[20].mxu0  ;;  %v1117_v17 = vpop.f32.mrb[20].mxu1 }
 0x12b   : > { %808 = vst [vmem:[%s1458_s28 + $0xb0] sm:$0xff] %v1085_v16  ;;  %840 = vst [vmem:[%s1458_s28 + $0x1b0] sm:$0xff] %v1117_v17  ;;  %v611_v18 = vpop.f32.mrb[21].mxu0  ;;  %v739_v19 = vpop.f32.mrb[21].mxu1 }
 0x12c   : > { %806 = vst [vmem:[%s1458_s28 + $0xa0] sm:$0xff] %v611_v18  ;;  %838 = vst [vmem:[%s1458_s28 + $0x1a0] sm:$0xff] %v739_v19  ;;  %v1086_v20 = vpop.f32.mrb[22].mxu0  ;;  %v1118_v21 = vpop.f32.mrb[22].mxu1 }
 0x12d   : > { %809 = vst [vmem:[%s1458_s28 + $0xb8] sm:$0xff] %v1086_v20  ;;  %841 = vst [vmem:[%s1458_s28 + $0x1b8] sm:$0xff] %v1118_v21  ;;  %v614_v22 = vpop.f32.mrb[23].mxu0  ;;  %v742_v23 = vpop.f32.mrb[23].mxu1 }
 0x12e   : > { %807 = vst [vmem:[%s1458_s28 + $0xa8] sm:$0xff] %v614_v22  ;;  %839 = vst [vmem:[%s1458_s28 + $0x1a8] sm:$0xff] %v742_v23 }
 0x132   : > { %v1089_v24 = vpop.f32.mrb[24].mxu0  ;;  %v1121_v25 = vpop.f32.mrb[24].mxu1 }
 0x133   : > { %812 = vst [vmem:[%s1458_s28 + $0xd0] sm:$0xff] %v1089_v24  ;;  %844 = vst [vmem:[%s1458_s28 + $0x1d0] sm:$0xff] %v1121_v25  ;;  %v627_v26 = vpop.f32.mrb[25].mxu0  ;;  %v755_v27 = vpop.f32.mrb[25].mxu1 }
 0x134   : > { %810 = vst [vmem:[%s1458_s28 + $0xc0] sm:$0xff] %v627_v26  ;;  %842 = vst [vmem:[%s1458_s28 + $0x1c0] sm:$0xff] %v755_v27  ;;  %v1090_v28 = vpop.f32.mrb[26].mxu0  ;;  %v1122_v29 = vpop.f32.mrb[26].mxu1 }
 0x135   : > { %813 = vst [vmem:[%s1458_s28 + $0xd8] sm:$0xff] %v1090_v28  ;;  %845 = vst [vmem:[%s1458_s28 + $0x1d8] sm:$0xff] %v1122_v29  ;;  %v630_v30 = vpop.f32.mrb[27].mxu0  ;;  %v758_v31 = vpop.f32.mrb[27].mxu1 }
 0x136   : > { %811 = vst [vmem:[%s1458_s28 + $0xc8] sm:$0xff] %v630_v30  ;;  %843 = vst [vmem:[%s1458_s28 + $0x1c8] sm:$0xff] %v758_v31 }
 0x13a   : > { %v1093_v32 = vpop.f32.mrb[28].mxu0  ;;  %v1125_v33 = vpop.f32.mrb[28].mxu1 }
 0x13b   : > { %816 = vst [vmem:[%s1458_s28 + $0xf0] sm:$0xff] %v1093_v32  ;;  %848 = vst [vmem:[%s1458_s28 + $0x1f0] sm:$0xff] %v1125_v33  ;;  %v643_v34 = vpop.f32.mrb[29].mxu0  ;;  %v771_v35 = vpop.f32.mrb[29].mxu1 }
 0x13c   : > { %814 = vst [vmem:[%s1458_s28 + $0xe0] sm:$0xff] %v643_v34  ;;  %846 = vst [vmem:[%s1458_s28 + $0x1e0] sm:$0xff] %v771_v35  ;;  %v1094_v36 = vpop.f32.mrb[30].mxu0  ;;  %v1126_v37 = vpop.f32.mrb[30].mxu1 }
 0x13d   : > { %817 = vst [vmem:[%s1458_s28 + $0xf8] sm:$0xff] %v1094_v36  ;;  %849 = vst [vmem:[%s1458_s28 + $0x1f8] sm:$0xff] %v1126_v37  ;;  %v646_v38 = vpop.f32.mrb[31].mxu0  ;;  %v774_v39 = vpop.f32.mrb[31].mxu1 }
 0x13e   : > { %815 = vst [vmem:[%s1458_s28 + $0xe8] sm:$0xff] %v646_v38  ;;  %847 = vst [vmem:[%s1458_s28 + $0x1e8] sm:$0xff] %v774_v39 }
 0x13f   : > { %1253 = shalt.err (!%p1250_p5)
}
 0x140   : > { %s1254_s16 = scalar_lea.hbm %s1523_s5, 8192  ;;  %s1258_s23 = scalar_lea.hbm %s1583_s2, 16384 }
 0x141   : > { %p1255_p6 = scmp.ne.s32.totalorder %s1523_s5, %s1254_s16  ;;  %p1259_p10 = scmp.lt.u32.totalorder %s1523_s5, %s1583_s2 }
 0x142   : > { %p1260_p11 = scmp.lt.u32.totalorder %s1258_s23, %s1254_s16  ;;  %p1262_p13 = scmp.lt.u32.totalorder %s1254_s16, %s1523_s5 }
 0x143   : > { %p1256_p7 = pnand %p1255_p6, %p1378_p4 }
 0x144   : > { %p1261_p12 = por %p1260_p11, %p1259_p10 }
 0x145   : > { %p1257_p9 = pneg %p1256_p7 }
 0x146   : > { %p1263_p0 = por %p1262_p13, %p1261_p12 }
 0x148   : > { %p1264_p1 = pnand %p1263_p0, %p1257_p9 }
 0x14a   : > { %1267 = shalt.err (!%p1264_p1)
}
 0x14b   : > { %s1321_s26 = smov 128   ;;  %s1322_s27 = smov 8  }
 0x14c   : > { %1143 = dma.vmem_to_hbm [thread:$0]  (%p1378_p4), %s1525_s30, 8192, %s1523_s5, %s1535_s12, %s1321_s26, %s1321_s26, %s1322_s27  }
 0x14d PF: > { %p1149_p2 = scmp.ge.s32.totalorder %s1318_s14, 2  ;;  %s880_s28 = sand.u32 1, %s1298_s9  }
 0x14e   : > { %s881_s29 = scalar_lea.sflag [#allocation3], %s880_s28 }
 0x14f   : > { %p1146_p3 = pnand %p1149_p2, %p1385_p8 }
 0x151   : > { %1293 = dma.done.wait (!%p1146_p3), %s881_s29, 8192  }
 0x152   : > { %1295 = vsyncadd (!%p1146_p3), %s881_s29, 4294959104  ;;  %s15_s14 = sadd.s32 1, %s1318_s14   ;;  %s1586_s9 = smov %s1302_s10 }
 0x153   : > { %p12_p5 = scmp.ge.s32.totalorder %s15_s14, 4   ;;  %s1587_s10 = smov %s1306_s11 }
 0x154   : > { %s1588_s11 = smov %s1391_s22  ;;  %s1589_s12 = smov %s1314_s13 }
 0x155   : > { %s1590_s13 = smov %s1592_s17  ;;  %14 = sbr.rel (!%p12_p5) target bundleno = 4 (0x4), region = 66 }
 0x15c   :  { %886 = vsyncpa [#allocation3], 1 }
 0x15d   :  { %888 = vsyncpa [#allocation3 + $0x1], 1 }

</bundles_post_ra>
